<compile_context>
chip_gen: v5e
topology: v5e:2x2
jax: 0.10.0
libtpu: 0.0.40
codegen_flags: <defaults>
</compile_context>

<pallas_src>
import functools

import jax
import jax.numpy as jnp
import numpy as np
from jax.experimental import pallas as pl
from jax.experimental.pallas import tpu as pltpu

LN_EPS = 1e-5  # PyTorch LayerNorm default


def _layer_norm(x, w, b):
    """LayerNorm over the last dim, in f32. x: (M, D), w/b: (1, D)."""
    mu = jnp.mean(x, axis=-1, keepdims=True)
    xc = x - mu
    var = jnp.mean(xc * xc, axis=-1, keepdims=True)
    return xc * jax.lax.rsqrt(var + LN_EPS) * w + b


# ---------------------------------------------------------------------------
# Fused Pallas kernel: all encoder layers + mean-pool, grid = (num_layers,)
# ---------------------------------------------------------------------------
def fused_encoder_kernel(x_ref, wqkv_ref, bqkv_ref, wo_ref, bo_ref,
                         n1w_ref, n1b_ref, n2w_ref, n2b_ref,
                         w1_ref, b1_ref, w2_ref, b2_ref,
                         out_ref, x_vmem, ctx_vmem, *, seq, batch, nhead):
    """One grid step == one post-norm TransformerEncoderLayer on the resident (B*S, D) activation."""
    layer = pl.program_id(0)
    D = x_ref.shape[-1]
    hd = D // nhead
    bf16 = jnp.bfloat16

    # Load the activation into the persistent VMEM scratch on the first layer only.
    @pl.when(layer == 0)
    def _():
        x_vmem[...] = x_ref[...]

    x = x_vmem[...]                                                      # (B*S, D) f32

    # --- fused QKV projection (weights pre-transposed to (D, 3D); Q pre-scaled) ---
    qkv = jnp.dot(x.astype(bf16), wqkv_ref[...],
                  preferred_element_type=jnp.float32) + bqkv_ref[...]    # (B*S, 3D) f32
    qkv3 = qkv.reshape(batch, seq, 3 * D)                                # (B, S, 3D)

    # --- multi-head self-attention: per-head, batched over B, slab writes ---------
    for h in range(nhead):                                               # static, small
        qh = qkv3[:, :, h * hd:(h + 1) * hd].astype(bf16)                # (B, S, hd)
        kh = qkv3[:, :, D + h * hd:D + (h + 1) * hd].astype(bf16)        # (B, S, hd)
        vh = qkv3[:, :, 2 * D + h * hd:2 * D + (h + 1) * hd].astype(bf16)

        s = jnp.einsum('bqd,bkd->bqk', qh, kh,
                       preferred_element_type=jnp.float32)               # (B, S, S) f32
        s = s - jnp.max(s, axis=-1, keepdims=True)
        p = jnp.exp(s)
        p = p * pl.reciprocal(jnp.sum(p, axis=-1, keepdims=True), approx=True)

        ctx_h = jnp.einsum('bqk,bkd->bqd', p.astype(bf16), vh,
                           preferred_element_type=jnp.float32)           # (B, S, hd) f32
        ctx_vmem[:, h * hd:(h + 1) * hd] = ctx_h.reshape(batch * seq, hd)

    ctx = ctx_vmem[...]                                                  # (B*S, D) f32
    attn = jnp.dot(ctx.astype(bf16), wo_ref[...],
                   preferred_element_type=jnp.float32) + bo_ref[...]     # (B*S, D)

    # residual + norm1 (dropout omitted: eval-mode identity), f32
    h1 = _layer_norm(x + attn, n1w_ref[...], n1b_ref[...])

    # --- feed-forward (Linear -> ReLU -> Linear), weights pre-transposed ----------
    f = jnp.dot(h1.astype(bf16), w1_ref[...],
                preferred_element_type=jnp.float32) + b1_ref[...]        # (B*S, F)
    f = jnp.maximum(f, 0.0)
    f = jnp.dot(f.astype(bf16), w2_ref[...],
                preferred_element_type=jnp.float32) + b2_ref[...]        # (B*S, D)

    # residual + norm2, f32
    h2 = _layer_norm(h1 + f, n2w_ref[...], n2b_ref[...])
    x_vmem[...] = h2                                                     # stays resident in VMEM

    # Final iteration: mean over the batch axis (PyTorch `mean(dim=1)`), lane-dense (S, D).
    @pl.when(layer == pl.num_programs(0) - 1)
    def _():
        pooled = jnp.mean(h2.reshape(batch, seq, D), axis=0)             # (S, D)
        out_ref[...] = pooled.astype(out_ref.dtype)


# ---------------------------------------------------------------------------
# Host-side weight preparation (stack layers, pre-transpose, fold scales, bf16)
# ---------------------------------------------------------------------------
def prepare_params(params, *, nhead):
    layers = params['layers']
    D = layers[0]['wqkv'].shape[1]
    hd = D // nhead
    scale = 1.0 / float(np.sqrt(hd))

    def stack(fn):
        return jnp.stack([fn(lp) for lp in layers], axis=0)

    def qkv_w(lp):
        w = lp['wqkv'].T                                  # (D, 3D)
        w = w.at[:, :D].multiply(scale)                   # fold 1/sqrt(hd) into Q cols
        return w.astype(jnp.bfloat16)

    def qkv_b(lp):
        return lp['bqkv'].at[:, :D].multiply(scale)       # (1, 3D), f32

    return dict(
        wqkv=stack(qkv_w),                                # (L, D, 3D)   bf16
        bqkv=stack(qkv_b),                                # (L, 1, 3D)   f32
        wo=stack(lambda lp: lp['wo'].T.astype(jnp.bfloat16)),   # (L, D, D)
        bo=stack(lambda lp: lp['bo']),                    # (L, 1, D)
        n1w=stack(lambda lp: lp['n1w']), n1b=stack(lambda lp: lp['n1b']),
        n2w=stack(lambda lp: lp['n2w']), n2b=stack(lambda lp: lp['n2b']),
        w1=stack(lambda lp: lp['w1'].T.astype(jnp.bfloat16)),   # (L, D, F)
        b1=stack(lambda lp: lp['b1']),                    # (L, 1, F)
        w2=stack(lambda lp: lp['w2'].T.astype(jnp.bfloat16)),   # (L, F, D)
        b2=stack(lambda lp: lp['b2']),                    # (L, 1, D)
        fc_w=params['fc_w'].T,                            # (D, 1), f32
        fc_b=params['fc_b'][0],                           # (1,),   f32
    )


# ---------------------------------------------------------------------------
# Wrapper
# ---------------------------------------------------------------------------
def transformer_regressor(src, prepared, *, nhead):
    """src: (S, B, D) like the PyTorch module (batch_first=False). Returns (S, 1)."""
    S, B, D = src.shape
    L = prepared['wqkv'].shape[0]
    F = prepared['w1'].shape[-1]

    x2 = jnp.transpose(src, (1, 0, 2)).reshape(B * S, D)   # (B*S, D), row = b*S + s

    lw = lambda l: (l, 0, 0)   # layer-indexed weight blocks (leading layer dim squeezed)
    pooled = pl.pallas_call(
        functools.partial(fused_encoder_kernel, seq=S, batch=B, nhead=nhead),
        out_shape=jax.ShapeDtypeStruct((S, D), jnp.float32),
        grid_spec=pltpu.PrefetchScalarGridSpec(
            num_scalar_prefetch=0,
            grid=(L,),
            in_specs=[
                pl.BlockSpec((B * S, D), lambda l: (0, 0)),        # activation (loaded once)
                pl.BlockSpec((None, D, 3 * D), lw),                # wqkv
                pl.BlockSpec((None, 1, 3 * D), lw),                # bqkv
                pl.BlockSpec((None, D, D), lw),                    # wo
                pl.BlockSpec((None, 1, D), lw),                    # bo
                pl.BlockSpec((None, 1, D), lw),                    # n1w
                pl.BlockSpec((None, 1, D), lw),                    # n1b
                pl.BlockSpec((None, 1, D), lw),                    # n2w
                pl.BlockSpec((None, 1, D), lw),                    # n2b
                pl.BlockSpec((None, D, F), lw),                    # w1
                pl.BlockSpec((None, 1, F), lw),                    # b1
                pl.BlockSpec((None, F, D), lw),                    # w2
                pl.BlockSpec((None, 1, D), lw),                    # b2
            ],
            out_specs=pl.BlockSpec((S, D), lambda l: (0, 0)),      # resident output
            scratch_shapes=[
                pltpu.VMEM((B * S, D), jnp.float32),               # resident activation
                pltpu.VMEM((B * S, D), jnp.float32),               # attention context slab
            ],
        ),
        compiler_params=pltpu.CompilerParams(
            dimension_semantics=("arbitrary",),
            vmem_limit_bytes=32 * 1024 * 1024,
        ),
    )(x2, prepared['wqkv'], prepared['bqkv'], prepared['wo'], prepared['bo'],
      prepared['n1w'], prepared['n1b'], prepared['n2w'], prepared['n2b'],
      prepared['w1'], prepared['b1'], prepared['w2'], prepared['b2'])

    # Tiny (S, D) @ (D, 1) head kept in the XLA wrapper so the kernel output stays lane-dense.
    return jnp.dot(pooled, prepared['fc_w']) + prepared['fc_b']          # (S, 1)


# ---------------------------------------------------------------------------
# Deterministic parameter init + pure-JAX reference (f32)
# ---------------------------------------------------------------------------
def init_params(key, d_model, nhead, num_layers, dim_ff):
    def dense(k, out_f, in_f):
        k1, k2 = jax.random.split(k)
        w = jax.random.normal(k1, (out_f, in_f), jnp.float32) * 0.05
        b = jax.random.normal(k2, (1, out_f), jnp.float32) * 0.05
        return w, b

    layers = []
    for _ in range(num_layers):
        key, k1, k2, k3, k4 = jax.random.split(key, 5)
        wqkv, bqkv = dense(k1, 3 * d_model, d_model)
        wo, bo = dense(k2, d_model, d_model)
        w1, b1 = dense(k3, dim_ff, d_model)
        w2, b2 = dense(k4, d_model, dim_ff)
        layers.append(dict(
            wqkv=wqkv, bqkv=bqkv, wo=wo, bo=bo,
            n1w=jnp.ones((1, d_model), jnp.float32), n1b=jnp.zeros((1, d_model), jnp.float32),
            n2w=jnp.ones((1, d_model), jnp.float32), n2b=jnp.zeros((1, d_model), jnp.float32),
            w1=w1, b1=b1, w2=w2, b2=b2))
    key, kf = jax.random.split(key)
    fc_w, fc_b = dense(kf, 1, d_model)
    return dict(layers=layers, fc_w=fc_w, fc_b=fc_b)


def reference_forward(src, params, nhead):
    """Plain-JAX f32 replica of the PyTorch forward (eval mode), for verification."""
    S, B, D = src.shape
    hd = D // nhead

    def ln(x, w, b):
        mu = jnp.mean(x, axis=-1, keepdims=True)
        xc = x - mu
        var = jnp.mean(xc * xc, axis=-1, keepdims=True)
        return xc * jax.lax.rsqrt(var + LN_EPS) * w + b

    x = src
    for lp in params['layers']:
        qkv = jnp.einsum('sbd,ed->sbe', x, lp['wqkv']) + lp['bqkv'][0]
        q = qkv[..., :D].reshape(S, B, nhead, hd) * (1.0 / np.sqrt(hd))
        k = qkv[..., D:2 * D].reshape(S, B, nhead, hd)
        v = qkv[..., 2 * D:].reshape(S, B, nhead, hd)
        s = jnp.einsum('sbhd,tbhd->bhst', q, k)
        p = jax.nn.softmax(s, axis=-1)
        ctx = jnp.einsum('bhst,tbhd->sbhd', p, v).reshape(S, B, D)
        attn = jnp.einsum('sbd,ed->sbe', ctx, lp['wo']) + lp['bo'][0]
        h1 = ln(x + attn, lp['n1w'][0], lp['n1b'][0])
        f = jax.nn.relu(jnp.einsum('sbd,fd->sbf', h1, lp['w1']) + lp['b1'][0])
        f = jnp.einsum('sbf,df->sbd', f, lp['w2']) + lp['b2'][0]
        x = ln(h1 + f, lp['n2w'][0], lp['n2b'][0])
    pooled = x.mean(axis=1)                                              # (S, D) == mean(dim=1)
    return jnp.einsum('sd,od->so', pooled, params['fc_w']) + params['fc_b'][0]   # (S, 1)


if __name__ == "__main__":
    # Small shapes consistent with the module (d_model divisible by nhead=8, lane-aligned).
    D_MODEL, NHEAD, NUM_LAYERS, DIM_FF = 128, 8, 2, 256
    SEQ, BATCH = 8, 2

    key = jax.random.PRNGKey(0)
    kp, kx = jax.random.split(key)
    params = init_params(kp, D_MODEL, NHEAD, NUM_LAYERS, DIM_FF)
    src = jax.random.normal(kx, (SEQ, BATCH, D_MODEL), jnp.float32)      # (seq, batch, d_model)

    prepared = prepare_params(params, nhead=NHEAD)
    fwd = jax.jit(functools.partial(transformer_regressor, nhead=NHEAD))
    out = jax.block_until_ready(fwd(src, prepared))                      # (SEQ, 1)

    ref = reference_forward(src, params, NHEAD)
    # bf16 MXU inputs (f32 accumulation) => relaxed tolerance vs. the f32 reference.
    np.testing.assert_allclose(np.asarray(out), np.asarray(ref), rtol=2e-2, atol=2e-2)

    print("KERNEL_OK")
</pallas_src>

<mosaic_0001>
module attributes {stable_mosaic.version = 11 : i64} {
  func.func @fused_encoder_kernel(%arg0: i32, %arg1: memref<16x128xf32, #tpu.memory_space<vmem>>, %arg2: memref<1x128x384xbf16, #tpu.memory_space<vmem>>, %arg3: memref<1x1x384xf32, #tpu.memory_space<vmem>>, %arg4: memref<1x128x128xbf16, #tpu.memory_space<vmem>>, %arg5: memref<1x1x128xf32, #tpu.memory_space<vmem>>, %arg6: memref<1x1x128xf32, #tpu.memory_space<vmem>>, %arg7: memref<1x1x128xf32, #tpu.memory_space<vmem>>, %arg8: memref<1x1x128xf32, #tpu.memory_space<vmem>>, %arg9: memref<1x1x128xf32, #tpu.memory_space<vmem>>, %arg10: memref<1x128x256xbf16, #tpu.memory_space<vmem>>, %arg11: memref<1x1x256xf32, #tpu.memory_space<vmem>>, %arg12: memref<1x256x128xbf16, #tpu.memory_space<vmem>>, %arg13: memref<1x1x128xf32, #tpu.memory_space<vmem>>, %arg14: memref<8x128xf32, #tpu.memory_space<vmem>>, %arg15: memref<16x128xf32, #tpu.memory_space<vmem>>, %arg16: memref<16x128xf32, #tpu.memory_space<vmem>>) attributes {dimension_semantics = [#tpu.dimension_semantics<arbitrary>], iteration_bounds = array<i64: 2>, scalar_prefetch = 0 : i64, scratch_operands = 2 : i64, tpu.core_type = #tpu.core_type<tc>, window_params = [{pipeline_mode = #tpu.pipeline_mode<synchronous>, transform_indices = @transform_0, window_bounds = array<i64: 16, 128>}, {transform_indices = @transform_1, window_bounds = array<i64: 1, 128, 384>}, {transform_indices = @transform_2, window_bounds = array<i64: 1, 1, 384>}, {transform_indices = @transform_3, window_bounds = array<i64: 1, 128, 128>}, {transform_indices = @transform_4, window_bounds = array<i64: 1, 1, 128>}, {transform_indices = @transform_5, window_bounds = array<i64: 1, 1, 128>}, {transform_indices = @transform_6, window_bounds = array<i64: 1, 1, 128>}, {transform_indices = @transform_7, window_bounds = array<i64: 1, 1, 128>}, {transform_indices = @transform_8, window_bounds = array<i64: 1, 1, 128>}, {transform_indices = @transform_9, window_bounds = array<i64: 1, 128, 256>}, {transform_indices = @transform_10, window_bounds = array<i64: 1, 1, 256>}, {transform_indices = @transform_11, window_bounds = array<i64: 1, 256, 128>}, {transform_indices = @transform_12, window_bounds = array<i64: 1, 1, 128>}, {pipeline_mode = #tpu.pipeline_mode<synchronous>, transform_indices = @transform_13, window_bounds = array<i64: 8, 128>}]} {
    %c0_i32 = arith.constant 0 : i32
    %0 = arith.cmpi eq, %arg0, %c0_i32 : i32
    %1 = arith.extui %0 : i1 to i32
    %c0_i32_0 = arith.constant 0 : i32
    %2 = arith.cmpi ne, %1, %c0_i32_0 : i32
    scf.if %2 {
      %c0_98 = arith.constant 0 : index
      %c0_99 = arith.constant 0 : index
      %262 = vector.load %arg1[%c0_98, %c0_99] : memref<16x128xf32, #tpu.memory_space<vmem>>, vector<16x128xf32>
      %c0_100 = arith.constant 0 : index
      %c0_101 = arith.constant 0 : index
      %263 = vector.load %arg15[%c0_100, %c0_101] : memref<16x128xf32, #tpu.memory_space<vmem>>, vector<16x128xf32>
      tpu.vector_store %arg15[%c0_100, %c0_101], %262 {strides = array<i32>} : memref<16x128xf32, #tpu.memory_space<vmem>>, vector<16x128xf32>,
    } else {
    }
    %c0 = arith.constant 0 : index
    %c0_1 = arith.constant 0 : index
    %3 = vector.load %arg15[%c0, %c0_1] : memref<16x128xf32, #tpu.memory_space<vmem>>, vector<16x128xf32>
    %4 = arith.truncf %3 : vector<16x128xf32> to vector<16x128xbf16>
    %c0_2 = arith.constant 0 : index
    %c0_3 = arith.constant 0 : index
    %c0_4 = arith.constant 0 : index
    %5 = vector.load %arg2[%c0_2, %c0_3, %c0_4] : memref<1x128x384xbf16, #tpu.memory_space<vmem>>, vector<1x128x384xbf16>
    %6 = vector.shape_cast %5 : vector<1x128x384xbf16> to vector<128x384xbf16>
    %cst = arith.constant dense<0.000000e+00> : vector<16x384xf32>
    %7 = tpu.matmul %4, %6, %cst {dimension_numbers = #tpu.dot_dimension_numbers<[1], [0], [0], [1], [0, 0, 1, 1], [], []>} : vector<16x128xbf16>, vector<128x384xbf16>, vector<16x384xf32> -> vector<16x384xf32>
    %c0_5 = arith.constant 0 : index
    %c0_6 = arith.constant 0 : index
    %c0_7 = arith.constant 0 : index
    %8 = vector.load %arg3[%c0_5, %c0_6, %c0_7] : memref<1x1x384xf32, #tpu.memory_space<vmem>>, vector<1x1x384xf32>
    %9 = vector.shape_cast %8 : vector<1x1x384xf32> to vector<1x384xf32>
    %10 = vector.broadcast %9 : vector<1x384xf32> to vector<16x384xf32>
    %11 = arith.addf %7, %10 : vector<16x384xf32>
    %12 = vector.shape_cast %11 : vector<16x384xf32> to vector<2x8x384xf32>
    %13 = vector.extract_strided_slice %12 {offsets = [0, 0, 0], sizes = [2, 8, 16], strides = [1, 1, 1]} : vector<2x8x384xf32> to vector<2x8x16xf32>
    %14 = arith.truncf %13 : vector<2x8x16xf32> to vector<2x8x16xbf16>
    %15 = vector.extract_strided_slice %12 {offsets = [0, 0, 128], sizes = [2, 8, 16], strides = [1, 1, 1]} : vector<2x8x384xf32> to vector<2x8x16xf32>
    %16 = arith.truncf %15 : vector<2x8x16xf32> to vector<2x8x16xbf16>
    %17 = vector.extract_strided_slice %12 {offsets = [0, 0, 256], sizes = [2, 8, 16], strides = [1, 1, 1]} : vector<2x8x384xf32> to vector<2x8x16xf32>
    %18 = arith.truncf %17 : vector<2x8x16xf32> to vector<2x8x16xbf16>
    "tpu.trace_start"() <{level = 10 : i32, message = "bqd,bkd->bqk"}> : () -> ()
    %cst_8 = arith.constant dense<0.000000e+00> : vector<2x8x8xf32>
    %19 = tpu.matmul %14, %16, %cst_8 {dimension_numbers = #tpu.dot_dimension_numbers<[2], [2], [1], [1], [0, 0, 0, 1, 1, 1], [0], [0]>} : vector<2x8x16xbf16>, vector<2x8x16xbf16>, vector<2x8x8xf32> -> vector<2x8x8xf32>
    "tpu.trace_stop"() : () -> ()
    %cst_9 = arith.constant dense<0xFF800000> : vector<2x8xf32>
    %20 = vector.multi_reduction <maximumf>, %19, %cst_9 [2] : vector<2x8x8xf32> to vector<2x8xf32>
    %21 = vector.shape_cast %20 : vector<2x8xf32> to vector<2x8x1xf32>
    %22 = vector.broadcast %21 : vector<2x8x1xf32> to vector<2x8x8xf32>
    %23 = arith.subf %19, %22 : vector<2x8x8xf32>
    %24 = math.exp %23 : vector<2x8x8xf32>
    %cst_10 = arith.constant dense<0.000000e+00> : vector<2x8xf32>
    %25 = vector.multi_reduction <add>, %24, %cst_10 [2] : vector<2x8x8xf32> to vector<2x8xf32>
    %26 = vector.shape_cast %25 : vector<2x8xf32> to vector<2x8x1xf32>
    %27 = tpu.reciprocal %26 {approx = true} : vector<2x8x1xf32> -> vector<2x8x1xf32>
    %28 = vector.broadcast %27 : vector<2x8x1xf32> to vector<2x8x8xf32>
    %29 = arith.mulf %24, %28 : vector<2x8x8xf32>
    %30 = arith.truncf %29 : vector<2x8x8xf32> to vector<2x8x8xbf16>
    "tpu.trace_start"() <{level = 10 : i32, message = "bqk,bkd->bqd"}> : () -> ()
    %cst_11 = arith.constant dense<0.000000e+00> : vector<2x8x16xf32>
    %31 = tpu.matmul %30, %18, %cst_11 {dimension_numbers = #tpu.dot_dimension_numbers<[2], [1], [1], [2], [0, 0, 0, 1, 1, 2], [0], [0]>} : vector<2x8x8xbf16>, vector<2x8x16xbf16>, vector<2x8x16xf32> -> vector<2x8x16xf32>
    "tpu.trace_stop"() : () -> ()
    %32 = vector.shape_cast %31 : vector<2x8x16xf32> to vector<16x16xf32>
    %c0_12 = arith.constant 0 : index
    %c0_13 = arith.constant 0 : index
    %33 = vector.load %arg16[%c0_12, %c0_13] : memref<16x128xf32, #tpu.memory_space<vmem>>, vector<16x16xf32>
    tpu.vector_store %arg16[%c0_12, %c0_13], %32 {strides = array<i32>} : memref<16x128xf32, #tpu.memory_space<vmem>>, vector<16x16xf32>,
    %34 = vector.extract_strided_slice %12 {offsets = [0, 0, 16], sizes = [2, 8, 16], strides = [1, 1, 1]} : vector<2x8x384xf32> to vector<2x8x16xf32>
    %35 = arith.truncf %34 : vector<2x8x16xf32> to vector<2x8x16xbf16>
    %36 = vector.extract_strided_slice %12 {offsets = [0, 0, 144], sizes = [2, 8, 16], strides = [1, 1, 1]} : vector<2x8x384xf32> to vector<2x8x16xf32>
    %37 = arith.truncf %36 : vector<2x8x16xf32> to vector<2x8x16xbf16>
    %38 = vector.extract_strided_slice %12 {offsets = [0, 0, 272], sizes = [2, 8, 16], strides = [1, 1, 1]} : vector<2x8x384xf32> to vector<2x8x16xf32>
    %39 = arith.truncf %38 : vector<2x8x16xf32> to vector<2x8x16xbf16>
    "tpu.trace_start"() <{level = 10 : i32, message = "bqd,bkd->bqk"}> : () -> ()
    %cst_14 = arith.constant dense<0.000000e+00> : vector<2x8x8xf32>
    %40 = tpu.matmul %35, %37, %cst_14 {dimension_numbers = #tpu.dot_dimension_numbers<[2], [2], [1], [1], [0, 0, 0, 1, 1, 1], [0], [0]>} : vector<2x8x16xbf16>, vector<2x8x16xbf16>, vector<2x8x8xf32> -> vector<2x8x8xf32>
    "tpu.trace_stop"() : () -> ()
    %cst_15 = arith.constant dense<0xFF800000> : vector<2x8xf32>
    %41 = vector.multi_reduction <maximumf>, %40, %cst_15 [2] : vector<2x8x8xf32> to vector<2x8xf32>
    %42 = vector.shape_cast %41 : vector<2x8xf32> to vector<2x8x1xf32>
    %43 = vector.broadcast %42 : vector<2x8x1xf32> to vector<2x8x8xf32>
    %44 = arith.subf %40, %43 : vector<2x8x8xf32>
    %45 = math.exp %44 : vector<2x8x8xf32>
    %cst_16 = arith.constant dense<0.000000e+00> : vector<2x8xf32>
    %46 = vector.multi_reduction <add>, %45, %cst_16 [2] : vector<2x8x8xf32> to vector<2x8xf32>
    %47 = vector.shape_cast %46 : vector<2x8xf32> to vector<2x8x1xf32>
    %48 = tpu.reciprocal %47 {approx = true} : vector<2x8x1xf32> -> vector<2x8x1xf32>
    %49 = vector.broadcast %48 : vector<2x8x1xf32> to vector<2x8x8xf32>
    %50 = arith.mulf %45, %49 : vector<2x8x8xf32>
    %51 = arith.truncf %50 : vector<2x8x8xf32> to vector<2x8x8xbf16>
    "tpu.trace_start"() <{level = 10 : i32, message = "bqk,bkd->bqd"}> : () -> ()
    %cst_17 = arith.constant dense<0.000000e+00> : vector<2x8x16xf32>
    %52 = tpu.matmul %51, %39, %cst_17 {dimension_numbers = #tpu.dot_dimension_numbers<[2], [1], [1], [2], [0, 0, 0, 1, 1, 2], [0], [0]>} : vector<2x8x8xbf16>, vector<2x8x16xbf16>, vector<2x8x16xf32> -> vector<2x8x16xf32>
    "tpu.trace_stop"() : () -> ()
    %53 = vector.shape_cast %52 : vector<2x8x16xf32> to vector<16x16xf32>
    %c0_18 = arith.constant 0 : index
    %c16 = arith.constant 16 : index
    %54 = vector.load %arg16[%c0_18, %c16] : memref<16x128xf32, #tpu.memory_space<vmem>>, vector<16x16xf32>
    tpu.vector_store %arg16[%c0_18, %c16], %53 {strides = array<i32>} : memref<16x128xf32, #tpu.memory_space<vmem>>, vector<16x16xf32>,
    %55 = vector.extract_strided_slice %12 {offsets = [0, 0, 32], sizes = [2, 8, 16], strides = [1, 1, 1]} : vector<2x8x384xf32> to vector<2x8x16xf32>
    %56 = arith.truncf %55 : vector<2x8x16xf32> to vector<2x8x16xbf16>
    %57 = vector.extract_strided_slice %12 {offsets = [0, 0, 160], sizes = [2, 8, 16], strides = [1, 1, 1]} : vector<2x8x384xf32> to vector<2x8x16xf32>
    %58 = arith.truncf %57 : vector<2x8x16xf32> to vector<2x8x16xbf16>
    %59 = vector.extract_strided_slice %12 {offsets = [0, 0, 288], sizes = [2, 8, 16], strides = [1, 1, 1]} : vector<2x8x384xf32> to vector<2x8x16xf32>
    %60 = arith.truncf %59 : vector<2x8x16xf32> to vector<2x8x16xbf16>
    "tpu.trace_start"() <{level = 10 : i32, message = "bqd,bkd->bqk"}> : () -> ()
    %cst_19 = arith.constant dense<0.000000e+00> : vector<2x8x8xf32>
    %61 = tpu.matmul %56, %58, %cst_19 {dimension_numbers = #tpu.dot_dimension_numbers<[2], [2], [1], [1], [0, 0, 0, 1, 1, 1], [0], [0]>} : vector<2x8x16xbf16>, vector<2x8x16xbf16>, vector<2x8x8xf32> -> vector<2x8x8xf32>
    "tpu.trace_stop"() : () -> ()
    %cst_20 = arith.constant dense<0xFF800000> : vector<2x8xf32>
    %62 = vector.multi_reduction <maximumf>, %61, %cst_20 [2] : vector<2x8x8xf32> to vector<2x8xf32>
    %63 = vector.shape_cast %62 : vector<2x8xf32> to vector<2x8x1xf32>
    %64 = vector.broadcast %63 : vector<2x8x1xf32> to vector<2x8x8xf32>
    %65 = arith.subf %61, %64 : vector<2x8x8xf32>
    %66 = math.exp %65 : vector<2x8x8xf32>
    %cst_21 = arith.constant dense<0.000000e+00> : vector<2x8xf32>
    %67 = vector.multi_reduction <add>, %66, %cst_21 [2] : vector<2x8x8xf32> to vector<2x8xf32>
    %68 = vector.shape_cast %67 : vector<2x8xf32> to vector<2x8x1xf32>
    %69 = tpu.reciprocal %68 {approx = true} : vector<2x8x1xf32> -> vector<2x8x1xf32>
    %70 = vector.broadcast %69 : vector<2x8x1xf32> to vector<2x8x8xf32>
    %71 = arith.mulf %66, %70 : vector<2x8x8xf32>
    %72 = arith.truncf %71 : vector<2x8x8xf32> to vector<2x8x8xbf16>
    "tpu.trace_start"() <{level = 10 : i32, message = "bqk,bkd->bqd"}> : () -> ()
    %cst_22 = arith.constant dense<0.000000e+00> : vector<2x8x16xf32>
    %73 = tpu.matmul %72, %60, %cst_22 {dimension_numbers = #tpu.dot_dimension_numbers<[2], [1], [1], [2], [0, 0, 0, 1, 1, 2], [0], [0]>} : vector<2x8x8xbf16>, vector<2x8x16xbf16>, vector<2x8x16xf32> -> vector<2x8x16xf32>
    "tpu.trace_stop"() : () -> ()
    %74 = vector.shape_cast %73 : vector<2x8x16xf32> to vector<16x16xf32>
    %c0_23 = arith.constant 0 : index
    %c32 = arith.constant 32 : index
    %75 = vector.load %arg16[%c0_23, %c32] : memref<16x128xf32, #tpu.memory_space<vmem>>, vector<16x16xf32>
    tpu.vector_store %arg16[%c0_23, %c32], %74 {strides = array<i32>} : memref<16x128xf32, #tpu.memory_space<vmem>>, vector<16x16xf32>,
    %76 = vector.extract_strided_slice %12 {offsets = [0, 0, 48], sizes = [2, 8, 16], strides = [1, 1, 1]} : vector<2x8x384xf32> to vector<2x8x16xf32>
    %77 = arith.truncf %76 : vector<2x8x16xf32> to vector<2x8x16xbf16>
    %78 = vector.extract_strided_slice %12 {offsets = [0, 0, 176], sizes = [2, 8, 16], strides = [1, 1, 1]} : vector<2x8x384xf32> to vector<2x8x16xf32>
    %79 = arith.truncf %78 : vector<2x8x16xf32> to vector<2x8x16xbf16>
    %80 = vector.extract_strided_slice %12 {offsets = [0, 0, 304], sizes = [2, 8, 16], strides = [1, 1, 1]} : vector<2x8x384xf32> to vector<2x8x16xf32>
    %81 = arith.truncf %80 : vector<2x8x16xf32> to vector<2x8x16xbf16>
    "tpu.trace_start"() <{level = 10 : i32, message = "bqd,bkd->bqk"}> : () -> ()
    %cst_24 = arith.constant dense<0.000000e+00> : vector<2x8x8xf32>
    %82 = tpu.matmul %77, %79, %cst_24 {dimension_numbers = #tpu.dot_dimension_numbers<[2], [2], [1], [1], [0, 0, 0, 1, 1, 1], [0], [0]>} : vector<2x8x16xbf16>, vector<2x8x16xbf16>, vector<2x8x8xf32> -> vector<2x8x8xf32>
    "tpu.trace_stop"() : () -> ()
    %cst_25 = arith.constant dense<0xFF800000> : vector<2x8xf32>
    %83 = vector.multi_reduction <maximumf>, %82, %cst_25 [2] : vector<2x8x8xf32> to vector<2x8xf32>
    %84 = vector.shape_cast %83 : vector<2x8xf32> to vector<2x8x1xf32>
    %85 = vector.broadcast %84 : vector<2x8x1xf32> to vector<2x8x8xf32>
    %86 = arith.subf %82, %85 : vector<2x8x8xf32>
    %87 = math.exp %86 : vector<2x8x8xf32>
    %cst_26 = arith.constant dense<0.000000e+00> : vector<2x8xf32>
    %88 = vector.multi_reduction <add>, %87, %cst_26 [2] : vector<2x8x8xf32> to vector<2x8xf32>
    %89 = vector.shape_cast %88 : vector<2x8xf32> to vector<2x8x1xf32>
    %90 = tpu.reciprocal %89 {approx = true} : vector<2x8x1xf32> -> vector<2x8x1xf32>
    %91 = vector.broadcast %90 : vector<2x8x1xf32> to vector<2x8x8xf32>
    %92 = arith.mulf %87, %91 : vector<2x8x8xf32>
    %93 = arith.truncf %92 : vector<2x8x8xf32> to vector<2x8x8xbf16>
    "tpu.trace_start"() <{level = 10 : i32, message = "bqk,bkd->bqd"}> : () -> ()
    %cst_27 = arith.constant dense<0.000000e+00> : vector<2x8x16xf32>
    %94 = tpu.matmul %93, %81, %cst_27 {dimension_numbers = #tpu.dot_dimension_numbers<[2], [1], [1], [2], [0, 0, 0, 1, 1, 2], [0], [0]>} : vector<2x8x8xbf16>, vector<2x8x16xbf16>, vector<2x8x16xf32> -> vector<2x8x16xf32>
    "tpu.trace_stop"() : () -> ()
    %95 = vector.shape_cast %94 : vector<2x8x16xf32> to vector<16x16xf32>
    %c0_28 = arith.constant 0 : index
    %c48 = arith.constant 48 : index
    %96 = vector.load %arg16[%c0_28, %c48] : memref<16x128xf32, #tpu.memory_space<vmem>>, vector<16x16xf32>
    tpu.vector_store %arg16[%c0_28, %c48], %95 {strides = array<i32>} : memref<16x128xf32, #tpu.memory_space<vmem>>, vector<16x16xf32>,
    %97 = vector.extract_strided_slice %12 {offsets = [0, 0, 64], sizes = [2, 8, 16], strides = [1, 1, 1]} : vector<2x8x384xf32> to vector<2x8x16xf32>
    %98 = arith.truncf %97 : vector<2x8x16xf32> to vector<2x8x16xbf16>
    %99 = vector.extract_strided_slice %12 {offsets = [0, 0, 192], sizes = [2, 8, 16], strides = [1, 1, 1]} : vector<2x8x384xf32> to vector<2x8x16xf32>
    %100 = arith.truncf %99 : vector<2x8x16xf32> to vector<2x8x16xbf16>
    %101 = vector.extract_strided_slice %12 {offsets = [0, 0, 320], sizes = [2, 8, 16], strides = [1, 1, 1]} : vector<2x8x384xf32> to vector<2x8x16xf32>
    %102 = arith.truncf %101 : vector<2x8x16xf32> to vector<2x8x16xbf16>
    "tpu.trace_start"() <{level = 10 : i32, message = "bqd,bkd->bqk"}> : () -> ()
    %cst_29 = arith.constant dense<0.000000e+00> : vector<2x8x8xf32>
    %103 = tpu.matmul %98, %100, %cst_29 {dimension_numbers = #tpu.dot_dimension_numbers<[2], [2], [1], [1], [0, 0, 0, 1, 1, 1], [0], [0]>} : vector<2x8x16xbf16>, vector<2x8x16xbf16>, vector<2x8x8xf32> -> vector<2x8x8xf32>
    "tpu.trace_stop"() : () -> ()
    %cst_30 = arith.constant dense<0xFF800000> : vector<2x8xf32>
    %104 = vector.multi_reduction <maximumf>, %103, %cst_30 [2] : vector<2x8x8xf32> to vector<2x8xf32>
    %105 = vector.shape_cast %104 : vector<2x8xf32> to vector<2x8x1xf32>
    %106 = vector.broadcast %105 : vector<2x8x1xf32> to vector<2x8x8xf32>
    %107 = arith.subf %103, %106 : vector<2x8x8xf32>
    %108 = math.exp %107 : vector<2x8x8xf32>
    %cst_31 = arith.constant dense<0.000000e+00> : vector<2x8xf32>
    %109 = vector.multi_reduction <add>, %108, %cst_31 [2] : vector<2x8x8xf32> to vector<2x8xf32>
    %110 = vector.shape_cast %109 : vector<2x8xf32> to vector<2x8x1xf32>
    %111 = tpu.reciprocal %110 {approx = true} : vector<2x8x1xf32> -> vector<2x8x1xf32>
    %112 = vector.broadcast %111 : vector<2x8x1xf32> to vector<2x8x8xf32>
    %113 = arith.mulf %108, %112 : vector<2x8x8xf32>
    %114 = arith.truncf %113 : vector<2x8x8xf32> to vector<2x8x8xbf16>
    "tpu.trace_start"() <{level = 10 : i32, message = "bqk,bkd->bqd"}> : () -> ()
    %cst_32 = arith.constant dense<0.000000e+00> : vector<2x8x16xf32>
    %115 = tpu.matmul %114, %102, %cst_32 {dimension_numbers = #tpu.dot_dimension_numbers<[2], [1], [1], [2], [0, 0, 0, 1, 1, 2], [0], [0]>} : vector<2x8x8xbf16>, vector<2x8x16xbf16>, vector<2x8x16xf32> -> vector<2x8x16xf32>
    "tpu.trace_stop"() : () -> ()
    %116 = vector.shape_cast %115 : vector<2x8x16xf32> to vector<16x16xf32>
    %c0_33 = arith.constant 0 : index
    %c64 = arith.constant 64 : index
    %117 = vector.load %arg16[%c0_33, %c64] : memref<16x128xf32, #tpu.memory_space<vmem>>, vector<16x16xf32>
    tpu.vector_store %arg16[%c0_33, %c64], %116 {strides = array<i32>} : memref<16x128xf32, #tpu.memory_space<vmem>>, vector<16x16xf32>,
    %118 = vector.extract_strided_slice %12 {offsets = [0, 0, 80], sizes = [2, 8, 16], strides = [1, 1, 1]} : vector<2x8x384xf32> to vector<2x8x16xf32>
    %119 = arith.truncf %118 : vector<2x8x16xf32> to vector<2x8x16xbf16>
    %120 = vector.extract_strided_slice %12 {offsets = [0, 0, 208], sizes = [2, 8, 16], strides = [1, 1, 1]} : vector<2x8x384xf32> to vector<2x8x16xf32>
    %121 = arith.truncf %120 : vector<2x8x16xf32> to vector<2x8x16xbf16>
    %122 = vector.extract_strided_slice %12 {offsets = [0, 0, 336], sizes = [2, 8, 16], strides = [1, 1, 1]} : vector<2x8x384xf32> to vector<2x8x16xf32>
    %123 = arith.truncf %122 : vector<2x8x16xf32> to vector<2x8x16xbf16>
    "tpu.trace_start"() <{level = 10 : i32, message = "bqd,bkd->bqk"}> : () -> ()
    %cst_34 = arith.constant dense<0.000000e+00> : vector<2x8x8xf32>
    %124 = tpu.matmul %119, %121, %cst_34 {dimension_numbers = #tpu.dot_dimension_numbers<[2], [2], [1], [1], [0, 0, 0, 1, 1, 1], [0], [0]>} : vector<2x8x16xbf16>, vector<2x8x16xbf16>, vector<2x8x8xf32> -> vector<2x8x8xf32>
    "tpu.trace_stop"() : () -> ()
    %cst_35 = arith.constant dense<0xFF800000> : vector<2x8xf32>
    %125 = vector.multi_reduction <maximumf>, %124, %cst_35 [2] : vector<2x8x8xf32> to vector<2x8xf32>
    %126 = vector.shape_cast %125 : vector<2x8xf32> to vector<2x8x1xf32>
    %127 = vector.broadcast %126 : vector<2x8x1xf32> to vector<2x8x8xf32>
    %128 = arith.subf %124, %127 : vector<2x8x8xf32>
    %129 = math.exp %128 : vector<2x8x8xf32>
    %cst_36 = arith.constant dense<0.000000e+00> : vector<2x8xf32>
    %130 = vector.multi_reduction <add>, %129, %cst_36 [2] : vector<2x8x8xf32> to vector<2x8xf32>
    %131 = vector.shape_cast %130 : vector<2x8xf32> to vector<2x8x1xf32>
    %132 = tpu.reciprocal %131 {approx = true} : vector<2x8x1xf32> -> vector<2x8x1xf32>
    %133 = vector.broadcast %132 : vector<2x8x1xf32> to vector<2x8x8xf32>
    %134 = arith.mulf %129, %133 : vector<2x8x8xf32>
    %135 = arith.truncf %134 : vector<2x8x8xf32> to vector<2x8x8xbf16>
    "tpu.trace_start"() <{level = 10 : i32, message = "bqk,bkd->bqd"}> : () -> ()
    %cst_37 = arith.constant dense<0.000000e+00> : vector<2x8x16xf32>
    %136 = tpu.matmul %135, %123, %cst_37 {dimension_numbers = #tpu.dot_dimension_numbers<[2], [1], [1], [2], [0, 0, 0, 1, 1, 2], [0], [0]>} : vector<2x8x8xbf16>, vector<2x8x16xbf16>, vector<2x8x16xf32> -> vector<2x8x16xf32>
    "tpu.trace_stop"() : () -> ()
    %137 = vector.shape_cast %136 : vector<2x8x16xf32> to vector<16x16xf32>
    %c0_38 = arith.constant 0 : index
    %c80 = arith.constant 80 : index
    %138 = vector.load %arg16[%c0_38, %c80] : memref<16x128xf32, #tpu.memory_space<vmem>>, vector<16x16xf32>
    tpu.vector_store %arg16[%c0_38, %c80], %137 {strides = array<i32>} : memref<16x128xf32, #tpu.memory_space<vmem>>, vector<16x16xf32>,
    %139 = vector.extract_strided_slice %12 {offsets = [0, 0, 96], sizes = [2, 8, 16], strides = [1, 1, 1]} : vector<2x8x384xf32> to vector<2x8x16xf32>
    %140 = arith.truncf %139 : vector<2x8x16xf32> to vector<2x8x16xbf16>
    %141 = vector.extract_strided_slice %12 {offsets = [0, 0, 224], sizes = [2, 8, 16], strides = [1, 1, 1]} : vector<2x8x384xf32> to vector<2x8x16xf32>
    %142 = arith.truncf %141 : vector<2x8x16xf32> to vector<2x8x16xbf16>
    %143 = vector.extract_strided_slice %12 {offsets = [0, 0, 352], sizes = [2, 8, 16], strides = [1, 1, 1]} : vector<2x8x384xf32> to vector<2x8x16xf32>
    %144 = arith.truncf %143 : vector<2x8x16xf32> to vector<2x8x16xbf16>
    "tpu.trace_start"() <{level = 10 : i32, message = "bqd,bkd->bqk"}> : () -> ()
    %cst_39 = arith.constant dense<0.000000e+00> : vector<2x8x8xf32>
    %145 = tpu.matmul %140, %142, %cst_39 {dimension_numbers = #tpu.dot_dimension_numbers<[2], [2], [1], [1], [0, 0, 0, 1, 1, 1], [0], [0]>} : vector<2x8x16xbf16>, vector<2x8x16xbf16>, vector<2x8x8xf32> -> vector<2x8x8xf32>
    "tpu.trace_stop"() : () -> ()
    %cst_40 = arith.constant dense<0xFF800000> : vector<2x8xf32>
    %146 = vector.multi_reduction <maximumf>, %145, %cst_40 [2] : vector<2x8x8xf32> to vector<2x8xf32>
    %147 = vector.shape_cast %146 : vector<2x8xf32> to vector<2x8x1xf32>
    %148 = vector.broadcast %147 : vector<2x8x1xf32> to vector<2x8x8xf32>
    %149 = arith.subf %145, %148 : vector<2x8x8xf32>
    %150 = math.exp %149 : vector<2x8x8xf32>
    %cst_41 = arith.constant dense<0.000000e+00> : vector<2x8xf32>
    %151 = vector.multi_reduction <add>, %150, %cst_41 [2] : vector<2x8x8xf32> to vector<2x8xf32>
    %152 = vector.shape_cast %151 : vector<2x8xf32> to vector<2x8x1xf32>
    %153 = tpu.reciprocal %152 {approx = true} : vector<2x8x1xf32> -> vector<2x8x1xf32>
    %154 = vector.broadcast %153 : vector<2x8x1xf32> to vector<2x8x8xf32>
    %155 = arith.mulf %150, %154 : vector<2x8x8xf32>
    %156 = arith.truncf %155 : vector<2x8x8xf32> to vector<2x8x8xbf16>
    "tpu.trace_start"() <{level = 10 : i32, message = "bqk,bkd->bqd"}> : () -> ()
    %cst_42 = arith.constant dense<0.000000e+00> : vector<2x8x16xf32>
    %157 = tpu.matmul %156, %144, %cst_42 {dimension_numbers = #tpu.dot_dimension_numbers<[2], [1], [1], [2], [0, 0, 0, 1, 1, 2], [0], [0]>} : vector<2x8x8xbf16>, vector<2x8x16xbf16>, vector<2x8x16xf32> -> vector<2x8x16xf32>
    "tpu.trace_stop"() : () -> ()
    %158 = vector.shape_cast %157 : vector<2x8x16xf32> to vector<16x16xf32>
    %c0_43 = arith.constant 0 : index
    %c96 = arith.constant 96 : index
    %159 = vector.load %arg16[%c0_43, %c96] : memref<16x128xf32, #tpu.memory_space<vmem>>, vector<16x16xf32>
    tpu.vector_store %arg16[%c0_43, %c96], %158 {strides = array<i32>} : memref<16x128xf32, #tpu.memory_space<vmem>>, vector<16x16xf32>,
    %160 = vector.extract_strided_slice %12 {offsets = [0, 0, 112], sizes = [2, 8, 16], strides = [1, 1, 1]} : vector<2x8x384xf32> to vector<2x8x16xf32>
    %161 = arith.truncf %160 : vector<2x8x16xf32> to vector<2x8x16xbf16>
    %162 = vector.extract_strided_slice %12 {offsets = [0, 0, 240], sizes = [2, 8, 16], strides = [1, 1, 1]} : vector<2x8x384xf32> to vector<2x8x16xf32>
    %163 = arith.truncf %162 : vector<2x8x16xf32> to vector<2x8x16xbf16>
    %164 = vector.extract_strided_slice %12 {offsets = [0, 0, 368], sizes = [2, 8, 16], strides = [1, 1, 1]} : vector<2x8x384xf32> to vector<2x8x16xf32>
    %165 = arith.truncf %164 : vector<2x8x16xf32> to vector<2x8x16xbf16>
    "tpu.trace_start"() <{level = 10 : i32, message = "bqd,bkd->bqk"}> : () -> ()
    %cst_44 = arith.constant dense<0.000000e+00> : vector<2x8x8xf32>
    %166 = tpu.matmul %161, %163, %cst_44 {dimension_numbers = #tpu.dot_dimension_numbers<[2], [2], [1], [1], [0, 0, 0, 1, 1, 1], [0], [0]>} : vector<2x8x16xbf16>, vector<2x8x16xbf16>, vector<2x8x8xf32> -> vector<2x8x8xf32>
    "tpu.trace_stop"() : () -> ()
    %cst_45 = arith.constant dense<0xFF800000> : vector<2x8xf32>
    %167 = vector.multi_reduction <maximumf>, %166, %cst_45 [2] : vector<2x8x8xf32> to vector<2x8xf32>
    %168 = vector.shape_cast %167 : vector<2x8xf32> to vector<2x8x1xf32>
    %169 = vector.broadcast %168 : vector<2x8x1xf32> to vector<2x8x8xf32>
    %170 = arith.subf %166, %169 : vector<2x8x8xf32>
    %171 = math.exp %170 : vector<2x8x8xf32>
    %cst_46 = arith.constant dense<0.000000e+00> : vector<2x8xf32>
    %172 = vector.multi_reduction <add>, %171, %cst_46 [2] : vector<2x8x8xf32> to vector<2x8xf32>
    %173 = vector.shape_cast %172 : vector<2x8xf32> to vector<2x8x1xf32>
    %174 = tpu.reciprocal %173 {approx = true} : vector<2x8x1xf32> -> vector<2x8x1xf32>
    %175 = vector.broadcast %174 : vector<2x8x1xf32> to vector<2x8x8xf32>
    %176 = arith.mulf %171, %175 : vector<2x8x8xf32>
    %177 = arith.truncf %176 : vector<2x8x8xf32> to vector<2x8x8xbf16>
    "tpu.trace_start"() <{level = 10 : i32, message = "bqk,bkd->bqd"}> : () -> ()
    %cst_47 = arith.constant dense<0.000000e+00> : vector<2x8x16xf32>
    %178 = tpu.matmul %177, %165, %cst_47 {dimension_numbers = #tpu.dot_dimension_numbers<[2], [1], [1], [2], [0, 0, 0, 1, 1, 2], [0], [0]>} : vector<2x8x8xbf16>, vector<2x8x16xbf16>, vector<2x8x16xf32> -> vector<2x8x16xf32>
    "tpu.trace_stop"() : () -> ()
    %179 = vector.shape_cast %178 : vector<2x8x16xf32> to vector<16x16xf32>
    %c0_48 = arith.constant 0 : index
    %c112 = arith.constant 112 : index
    %180 = vector.load %arg16[%c0_48, %c112] : memref<16x128xf32, #tpu.memory_space<vmem>>, vector<16x16xf32>
    tpu.vector_store %arg16[%c0_48, %c112], %179 {strides = array<i32>} : memref<16x128xf32, #tpu.memory_space<vmem>>, vector<16x16xf32>,
    %c0_49 = arith.constant 0 : index
    %c0_50 = arith.constant 0 : index
    %181 = vector.load %arg16[%c0_49, %c0_50] : memref<16x128xf32, #tpu.memory_space<vmem>>, vector<16x128xf32>
    %182 = arith.truncf %181 : vector<16x128xf32> to vector<16x128xbf16>
    %c0_51 = arith.constant 0 : index
    %c0_52 = arith.constant 0 : index
    %c0_53 = arith.constant 0 : index
    %183 = vector.load %arg4[%c0_51, %c0_52, %c0_53] : memref<1x128x128xbf16, #tpu.memory_space<vmem>>, vector<1x128x128xbf16>
    %184 = vector.shape_cast %183 : vector<1x128x128xbf16> to vector<128x128xbf16>
    %cst_54 = arith.constant dense<0.000000e+00> : vector<16x128xf32>
    %185 = tpu.matmul %182, %184, %cst_54 {dimension_numbers = #tpu.dot_dimension_numbers<[1], [0], [0], [1], [0, 0, 1, 1], [], []>} : vector<16x128xbf16>, vector<128x128xbf16>, vector<16x128xf32> -> vector<16x128xf32>
    %c0_55 = arith.constant 0 : index
    %c0_56 = arith.constant 0 : index
    %c0_57 = arith.constant 0 : index
    %186 = vector.load %arg5[%c0_55, %c0_56, %c0_57] : memref<1x1x128xf32, #tpu.memory_space<vmem>>, vector<1x1x128xf32>
    %187 = vector.shape_cast %186 : vector<1x1x128xf32> to vector<1x128xf32>
    %188 = vector.broadcast %187 : vector<1x128xf32> to vector<16x128xf32>
    %189 = arith.addf %185, %188 : vector<16x128xf32>
    %190 = arith.addf %3, %189 : vector<16x128xf32>
    %c0_58 = arith.constant 0 : index
    %c0_59 = arith.constant 0 : index
    %c0_60 = arith.constant 0 : index
    %191 = vector.load %arg6[%c0_58, %c0_59, %c0_60] : memref<1x1x128xf32, #tpu.memory_space<vmem>>, vector<1x1x128xf32>
    %192 = vector.shape_cast %191 : vector<1x1x128xf32> to vector<1x128xf32>
    %c0_61 = arith.constant 0 : index
    %c0_62 = arith.constant 0 : index
    %c0_63 = arith.constant 0 : index
    %193 = vector.load %arg7[%c0_61, %c0_62, %c0_63] : memref<1x1x128xf32, #tpu.memory_space<vmem>>, vector<1x1x128xf32>
    %194 = vector.shape_cast %193 : vector<1x1x128xf32> to vector<1x128xf32>
    %cst_64 = arith.constant dense<0.000000e+00> : vector<16xf32>
    %195 = vector.multi_reduction <add>, %190, %cst_64 [1] : vector<16x128xf32> to vector<16xf32>
    %196 = vector.shape_cast %195 : vector<16xf32> to vector<16x1xf32>
    %cst_65 = arith.constant 1.280000e+02 : f32
    %197 = vector.broadcast %cst_65 : f32 to vector<16x1xf32>
    %198 = arith.divf %196, %197 : vector<16x1xf32>
    %199 = vector.broadcast %198 : vector<16x1xf32> to vector<16x128xf32>
    %200 = arith.subf %190, %199 : vector<16x128xf32>
    %201 = arith.mulf %200, %200 : vector<16x128xf32>
    %cst_66 = arith.constant dense<0.000000e+00> : vector<16xf32>
    %202 = vector.multi_reduction <add>, %201, %cst_66 [1] : vector<16x128xf32> to vector<16xf32>
    %203 = vector.shape_cast %202 : vector<16xf32> to vector<16x1xf32>
    %cst_67 = arith.constant 1.280000e+02 : f32
    %204 = vector.broadcast %cst_67 : f32 to vector<16x1xf32>
    %205 = arith.divf %203, %204 : vector<16x1xf32>
    %cst_68 = arith.constant 9.99999974E-6 : f32
    %206 = vector.broadcast %cst_68 : f32 to vector<16x1xf32>
    %207 = arith.addf %205, %206 : vector<16x1xf32>
    %208 = math.rsqrt %207 : vector<16x1xf32>
    %209 = vector.broadcast %208 : vector<16x1xf32> to vector<16x128xf32>
    %210 = arith.mulf %200, %209 : vector<16x128xf32>
    %211 = vector.broadcast %192 : vector<1x128xf32> to vector<16x128xf32>
    %212 = arith.mulf %210, %211 : vector<16x128xf32>
    %213 = vector.broadcast %194 : vector<1x128xf32> to vector<16x128xf32>
    %214 = arith.addf %212, %213 : vector<16x128xf32>
    %215 = arith.truncf %214 : vector<16x128xf32> to vector<16x128xbf16>
    %c0_69 = arith.constant 0 : index
    %c0_70 = arith.constant 0 : index
    %c0_71 = arith.constant 0 : index
    %216 = vector.load %arg10[%c0_69, %c0_70, %c0_71] : memref<1x128x256xbf16, #tpu.memory_space<vmem>>, vector<1x128x256xbf16>
    %217 = vector.shape_cast %216 : vector<1x128x256xbf16> to vector<128x256xbf16>
    %cst_72 = arith.constant dense<0.000000e+00> : vector<16x256xf32>
    %218 = tpu.matmul %215, %217, %cst_72 {dimension_numbers = #tpu.dot_dimension_numbers<[1], [0], [0], [1], [0, 0, 1, 1], [], []>} : vector<16x128xbf16>, vector<128x256xbf16>, vector<16x256xf32> -> vector<16x256xf32>
    %c0_73 = arith.constant 0 : index
    %c0_74 = arith.constant 0 : index
    %c0_75 = arith.constant 0 : index
    %219 = vector.load %arg11[%c0_73, %c0_74, %c0_75] : memref<1x1x256xf32, #tpu.memory_space<vmem>>, vector<1x1x256xf32>
    %220 = vector.shape_cast %219 : vector<1x1x256xf32> to vector<1x256xf32>
    %221 = vector.broadcast %220 : vector<1x256xf32> to vector<16x256xf32>
    %222 = arith.addf %218, %221 : vector<16x256xf32>
    %cst_76 = arith.constant 0.000000e+00 : f32
    %223 = vector.broadcast %cst_76 : f32 to vector<16x256xf32>
    %224 = arith.maximumf %222, %223 : vector<16x256xf32>
    %225 = arith.truncf %224 : vector<16x256xf32> to vector<16x256xbf16>
    %c0_77 = arith.constant 0 : index
    %c0_78 = arith.constant 0 : index
    %c0_79 = arith.constant 0 : index
    %226 = vector.load %arg12[%c0_77, %c0_78, %c0_79] : memref<1x256x128xbf16, #tpu.memory_space<vmem>>, vector<1x256x128xbf16>
    %227 = vector.shape_cast %226 : vector<1x256x128xbf16> to vector<256x128xbf16>
    %cst_80 = arith.constant dense<0.000000e+00> : vector<16x128xf32>
    %228 = tpu.matmul %225, %227, %cst_80 {dimension_numbers = #tpu.dot_dimension_numbers<[1], [0], [0], [1], [0, 0, 1, 1], [], []>} : vector<16x256xbf16>, vector<256x128xbf16>, vector<16x128xf32> -> vector<16x128xf32>
    %c0_81 = arith.constant 0 : index
    %c0_82 = arith.constant 0 : index
    %c0_83 = arith.constant 0 : index
    %229 = vector.load %arg13[%c0_81, %c0_82, %c0_83] : memref<1x1x128xf32, #tpu.memory_space<vmem>>, vector<1x1x128xf32>
    %230 = vector.shape_cast %229 : vector<1x1x128xf32> to vector<1x128xf32>
    %231 = vector.broadcast %230 : vector<1x128xf32> to vector<16x128xf32>
    %232 = arith.addf %228, %231 : vector<16x128xf32>
    %233 = arith.addf %214, %232 : vector<16x128xf32>
    %c0_84 = arith.constant 0 : index
    %c0_85 = arith.constant 0 : index
    %c0_86 = arith.constant 0 : index
    %234 = vector.load %arg8[%c0_84, %c0_85, %c0_86] : memref<1x1x128xf32, #tpu.memory_space<vmem>>, vector<1x1x128xf32>
    %235 = vector.shape_cast %234 : vector<1x1x128xf32> to vector<1x128xf32>
    %c0_87 = arith.constant 0 : index
    %c0_88 = arith.constant 0 : index
    %c0_89 = arith.constant 0 : index
    %236 = vector.load %arg9[%c0_87, %c0_88, %c0_89] : memref<1x1x128xf32, #tpu.memory_space<vmem>>, vector<1x1x128xf32>
    %237 = vector.shape_cast %236 : vector<1x1x128xf32> to vector<1x128xf32>
    %cst_90 = arith.constant dense<0.000000e+00> : vector<16xf32>
    %238 = vector.multi_reduction <add>, %233, %cst_90 [1] : vector<16x128xf32> to vector<16xf32>
    %239 = vector.shape_cast %238 : vector<16xf32> to vector<16x1xf32>
    %cst_91 = arith.constant 1.280000e+02 : f32
    %240 = vector.broadcast %cst_91 : f32 to vector<16x1xf32>
    %241 = arith.divf %239, %240 : vector<16x1xf32>
    %242 = vector.broadcast %241 : vector<16x1xf32> to vector<16x128xf32>
    %243 = arith.subf %233, %242 : vector<16x128xf32>
    %244 = arith.mulf %243, %243 : vector<16x128xf32>
    %cst_92 = arith.constant dense<0.000000e+00> : vector<16xf32>
    %245 = vector.multi_reduction <add>, %244, %cst_92 [1] : vector<16x128xf32> to vector<16xf32>
    %246 = vector.shape_cast %245 : vector<16xf32> to vector<16x1xf32>
    %cst_93 = arith.constant 1.280000e+02 : f32
    %247 = vector.broadcast %cst_93 : f32 to vector<16x1xf32>
    %248 = arith.divf %246, %247 : vector<16x1xf32>
    %cst_94 = arith.constant 9.99999974E-6 : f32
    %249 = vector.broadcast %cst_94 : f32 to vector<16x1xf32>
    %250 = arith.addf %248, %249 : vector<16x1xf32>
    %251 = math.rsqrt %250 : vector<16x1xf32>
    %252 = vector.broadcast %251 : vector<16x1xf32> to vector<16x128xf32>
    %253 = arith.mulf %243, %252 : vector<16x128xf32>
    %254 = vector.broadcast %235 : vector<1x128xf32> to vector<16x128xf32>
    %255 = arith.mulf %253, %254 : vector<16x128xf32>
    %256 = vector.broadcast %237 : vector<1x128xf32> to vector<16x128xf32>
    %257 = arith.addf %255, %256 : vector<16x128xf32>
    %c0_95 = arith.constant 0 : index
    %c0_96 = arith.constant 0 : index
    %258 = vector.load %arg15[%c0_95, %c0_96] : memref<16x128xf32, #tpu.memory_space<vmem>>, vector<16x128xf32>
    tpu.vector_store %arg15[%c0_95, %c0_96], %257 {strides = array<i32>} : memref<16x128xf32, #tpu.memory_space<vmem>>, vector<16x128xf32>,
    %c1_i32 = arith.constant 1 : i32
    %259 = arith.cmpi eq, %arg0, %c1_i32 : i32
    %260 = arith.extui %259 : i1 to i32
    %c0_i32_97 = arith.constant 0 : i32
    %261 = arith.cmpi ne, %260, %c0_i32_97 : i32
    scf.if %261 {
      %262 = vector.shape_cast %257 : vector<16x128xf32> to vector<2x8x128xf32>
      %cst_98 = arith.constant dense<0.000000e+00> : vector<8x128xf32>
      %263 = vector.multi_reduction <add>, %262, %cst_98 [0] : vector<2x8x128xf32> to vector<8x128xf32>
      %cst_99 = arith.constant 2.000000e+00 : f32
      %264 = vector.broadcast %cst_99 : f32 to vector<8x128xf32>
      %265 = arith.divf %263, %264 : vector<8x128xf32>
      %c0_100 = arith.constant 0 : index
      %c0_101 = arith.constant 0 : index
      %266 = vector.load %arg14[%c0_100, %c0_101] : memref<8x128xf32, #tpu.memory_space<vmem>>, vector<8x128xf32>
      tpu.vector_store %arg14[%c0_100, %c0_101], %265 {strides = array<i32>} : memref<8x128xf32, #tpu.memory_space<vmem>>, vector<8x128xf32>,
    } else {
    }
    return
  }
  func.func @transform_0(%arg0: i32) -> (i32, i32) {
    %c0_i32 = arith.constant 0 : i32
    %c0_i32_0 = arith.constant 0 : i32
    %c0_i32_1 = arith.constant 0 : i32
    return %c0_i32, %c0_i32_0 : i32, i32
  }
  func.func @transform_1(%arg0: i32) -> (i32, i32, i32) {
    %c0_i32 = arith.constant 0 : i32
    %c0_i32_0 = arith.constant 0 : i32
    %c0_i32_1 = arith.constant 0 : i32
    return %arg0, %c0_i32, %c0_i32_0 : i32, i32, i32
  }
  func.func @transform_2(%arg0: i32) -> (i32, i32, i32) {
    %c0_i32 = arith.constant 0 : i32
    %c0_i32_0 = arith.constant 0 : i32
    %c0_i32_1 = arith.constant 0 : i32
    return %arg0, %c0_i32, %c0_i32_0 : i32, i32, i32
  }
  func.func @transform_3(%arg0: i32) -> (i32, i32, i32) {
    %c0_i32 = arith.constant 0 : i32
    %c0_i32_0 = arith.constant 0 : i32
    %c0_i32_1 = arith.constant 0 : i32
    return %arg0, %c0_i32, %c0_i32_0 : i32, i32, i32
  }
  func.func @transform_4(%arg0: i32) -> (i32, i32, i32) {
    %c0_i32 = arith.constant 0 : i32
    %c0_i32_0 = arith.constant 0 : i32
    %c0_i32_1 = arith.constant 0 : i32
    return %arg0, %c0_i32, %c0_i32_0 : i32, i32, i32
  }
  func.func @transform_5(%arg0: i32) -> (i32, i32, i32) {
    %c0_i32 = arith.constant 0 : i32
    %c0_i32_0 = arith.constant 0 : i32
    %c0_i32_1 = arith.constant 0 : i32
    return %arg0, %c0_i32, %c0_i32_0 : i32, i32, i32
  }
  func.func @transform_6(%arg0: i32) -> (i32, i32, i32) {
    %c0_i32 = arith.constant 0 : i32
    %c0_i32_0 = arith.constant 0 : i32
    %c0_i32_1 = arith.constant 0 : i32
    return %arg0, %c0_i32, %c0_i32_0 : i32, i32, i32
  }
  func.func @transform_7(%arg0: i32) -> (i32, i32, i32) {
    %c0_i32 = arith.constant 0 : i32
    %c0_i32_0 = arith.constant 0 : i32
    %c0_i32_1 = arith.constant 0 : i32
    return %arg0, %c0_i32, %c0_i32_0 : i32, i32, i32
  }
  func.func @transform_8(%arg0: i32) -> (i32, i32, i32) {
    %c0_i32 = arith.constant 0 : i32
    %c0_i32_0 = arith.constant 0 : i32
    %c0_i32_1 = arith.constant 0 : i32
    return %arg0, %c0_i32, %c0_i32_0 : i32, i32, i32
  }
  func.func @transform_9(%arg0: i32) -> (i32, i32, i32) {
    %c0_i32 = arith.constant 0 : i32
    %c0_i32_0 = arith.constant 0 : i32
    %c0_i32_1 = arith.constant 0 : i32
    return %arg0, %c0_i32, %c0_i32_0 : i32, i32, i32
  }
  func.func @transform_10(%arg0: i32) -> (i32, i32, i32) {
    %c0_i32 = arith.constant 0 : i32
    %c0_i32_0 = arith.constant 0 : i32
    %c0_i32_1 = arith.constant 0 : i32
    return %arg0, %c0_i32, %c0_i32_0 : i32, i32, i32
  }
  func.func @transform_11(%arg0: i32) -> (i32, i32, i32) {
    %c0_i32 = arith.constant 0 : i32
    %c0_i32_0 = arith.constant 0 : i32
    %c0_i32_1 = arith.constant 0 : i32
    return %arg0, %c0_i32, %c0_i32_0 : i32, i32, i32
  }
  func.func @transform_12(%arg0: i32) -> (i32, i32, i32) {
    %c0_i32 = arith.constant 0 : i32
    %c0_i32_0 = arith.constant 0 : i32
    %c0_i32_1 = arith.constant 0 : i32
    return %arg0, %c0_i32, %c0_i32_0 : i32, i32, i32
  }
  func.func @transform_13(%arg0: i32) -> (i32, i32) {
    %c0_i32 = arith.constant 0 : i32
    %c0_i32_0 = arith.constant 0 : i32
    %c0_i32_1 = arith.constant 0 : i32
    return %c0_i32, %c0_i32_0 : i32, i32
  }
}

</mosaic_0001>

<bundles_post_ra>
// kernel: transformer_regressor.1
= control target key start
LH: loop header
LB: loop body
LE: loop exit
PB: predicated region body
PF: predicated region fallthrough
CT: control target
= control target key end

     0   :  { %s4079_s0 = inlined_call_operand.vmem [shape: f32[16,128], index: 0, kind: input, shape index: {}]   ;;  %s4080_s1 = inlined_call_operand.hbm [shape: bf16[2,128,384], index: 1, kind: input, shape index: {}]   ;;  %s4081_s2 = inlined_call_operand.vmem [shape: f32[2,1,384], index: 2, kind: input, shape index: {}]   ;;  %s4082_s3 = inlined_call_operand.hbm [shape: bf16[2,128,128], index: 3, kind: input, shape index: {}]   ;;  %s4083_s4 = inlined_call_operand.vmem [shape: f32[2,1,128], index: 4, kind: input, shape index: {}]   ;;  %s4084_s5 = inlined_call_operand.vmem [shape: f32[2,1,128], index: 5, kind: input, shape index: {}]   ;;  %s4085_s6 = inlined_call_operand.vmem [shape: f32[2,1,128], index: 6, kind: input, shape index: {}]   ;;  %s4086_s7 = inlined_call_operand.vmem [shape: f32[2,1,128], index: 7, kind: input, shape index: {}]   ;;  %s4087_s8 = inlined_call_operand.vmem [shape: f32[2,1,128], index: 8, kind: input, shape index: {}]   ;;  %s4088_s9 = inlined_call_operand.hbm [shape: bf16[2,128,256], index: 9, kind: input, shape index: {}]   ;;  %s4089_s10 = inlined_call_operand.vmem [shape: f32[2,1,256], index: 10, kind: input, shape index: {}]   ;;  %s4090_s11 = inlined_call_operand.hbm [shape: bf16[2,256,128], index: 11, kind: input, shape index: {}]   ;;  %s4091_s12 = inlined_call_operand.vmem [shape: f32[2,1,128], index: 12, kind: input, shape index: {}]   ;;  %s4092_s13 = inlined_call_operand.vmem [shape: f32[8,128], index: 13, kind: output, shape index: {}]  }
   0x1   :  { %4099 = sst [smem:[#allocation17_spill]] %s4079_s0 }
   0x2   :  { %4100 = sst [smem:[#allocation18_spill]] %s4080_s1 }
   0x3   :  { %4101 = sst [smem:[#allocation19_spill]] %s4082_s3 }
   0x4   :  { %4102 = sst [smem:[#allocation20_spill]] %s4087_s8 }
   0x5   :  { %4103 = sst [smem:[#allocation21_spill]] %s4088_s9 }
   0x6   :  { %4104 = sst [smem:[#allocation22_spill]] %s4089_s10 }
   0x7   :  { %4105 = sst [smem:[#allocation23_spill]] %s4090_s11 }
   0x8   :  { %4106 = sst [smem:[#allocation24_spill]] %s4091_s12 }
   0x9   :  { %4107 = sst [smem:[#allocation25_spill]] %s4092_s13 }
   0xa   :  { %18 = vsyncpa [#allocation5], 0 }
   0xb   :  { %20 = vsyncpa [#allocation5 + $0x1], 0 }
   0xc   :  { %21 = vsyncpa [#allocation7], 0 }
   0xd   :  { %23 = vsyncpa [#allocation7 + $0x1], 0 }
   0xe   :  { %24 = vsyncpa [#allocation10], 0 }
   0xf   :  { %26 = vsyncpa [#allocation10 + $0x1], 0  ;;  %s3380_s25 = smov 0   ;;  %s3382_s26 = smov 0  }
  0x10   :  { %s3384_s27 = smov 0   ;;  %s3386_s28 = smov 0  }
  0x11 LB: > { %4108 = sst [smem:[#allocation14_spill]] %s3289_s27  ;;  %s3399_s29 = sadd.s32 4294967295, %s3293_s28   ;;  %s3293_s28 = sphi %s3386_s28, %s4130_s28   ;;  %s3289_s27 = sphi %s3384_s27, %s4132_s27   ;;  %s3285_s26 = sphi %s3382_s26, %s4134_s26   ;;  %s3281_s25 = sphi %s3380_s25, %s4133_s25  }
  0x12   : > { %s3402_s30 = sadd.s32 1, %s3293_s28   ;;  %s60_s15 = sadd.s32 1, %s3289_s27 }
  0x13   : > { %4109 = sst [smem:[#allocation15_spill]] %s3402_s30  ;;  %s57_s14 = ssub.s32 %s3293_s28, %s3402_s30 }
  0x14   : > { %p58_p0 = scmp.eq.s32.totalorder %s57_s14, 0  ;;  %p67_p1 = scmp.ne.s32.totalorder %s3289_s27, %s3285_s26 }
  0x15   : > { %p68_p2 = scmp.eq.s32.totalorder %s3293_s28, 0  ;;  %p73_p3 = scmp.ne.s32.totalorder %s3285_s26, %s3281_s25 }
  0x16   : > { %s3412_s16 = scalar_select %p58_p0, %s3289_s27, %s60_s15  }
  0x17   : > { %p69_p4 = por %p68_p2, %p67_p1  ;;  %p74_p5 = scmp.eq.s32.totalorder %s3399_s29, 0 }
  0x18   : > { %4110 = sst [smem:[#allocation16_spill]] %s3412_s16  ;;  %p2999_p6 = scmp.lt.s32.totalorder %s3293_s28, 2 }
  0x19   : > { %p3416_p7 = por %p74_p5, %p73_p3  ;;  %s3421_s18 = sand.u32 1, %s3289_s27  }
  0x1a   : > { %p3423_p8 = pnand %p2999_p6, %p69_p4  ;;  %s436_s20 = sand.u32 1, %s3293_s28  }
  0x1b   : > { %s2601_s21 = sshll.u32 %s3421_s18, 6  ;;  %s2907_s22 = sshll.u32 %s3293_s28, 6 }
  0x1c   : > { %s440_s23 = scalar_lea.vmem [#allocation6], %s2601_s21  ;;  %s4113_s3 = sld [smem:[#allocation19_spill]] }
  0x1d   : > { %s448_s24 = sshll.u32 %s440_s23, 4  ;;  %s3433_s27 = scalar_lea.sflag [#allocation7], %s436_s20  ;;  %s449_s24 = int_to_ptr.vmem [resolvable:$true] %s448_s24 }
  0x1e   : > { %p3135_p10 = pneg %p3423_p8 }
  0x22   : > { %s445_s15 = scalar_lea.hbm %s4113_s3, %s2907_s22  ;;  %s3138_s25 = scalar_lea.hbm %s4113_s3, 128 }
  0x23   : > { %s446_s16 = sshll.u32 %s445_s15, 4  ;;  %s447_s16 = int_to_ptr.hbm [resolvable:$true] %s446_s16 }
  0x24   : > { %s3131_s30 = sshra.s32 %s447_s16, 4  ;;  %s3132_s30 = int_to_ptr.hbm [resolvable:$true] %s3131_s30 }
  0x25   : > { %s3133_s13 = scalar_lea.hbm %s3132_s30, 64  ;;  %p3139_p13 = scmp.lt.s32.totalorder %s3132_s30, %s4113_s3 }
  0x26   : > { %p3134_p9 = scmp.ne.s32.totalorder %s3132_s30, %s3133_s13  ;;  %p3140_p0 = scmp.lt.s32.totalorder %s3138_s25, %s3133_s13 }
  0x28   : > { %p3136_p11 = pnand %p3135_p10, %p3134_p9  ;;  %p3141_p1 = por %p3140_p0, %p3139_p13 }
  0x2a   : > { %p3137_p12 = pneg %p3136_p11 }
  0x2c   : > { %p3142_p2 = pnand %p3141_p1, %p3137_p12 }
  0x2e   : > { %3145 = shalt.err (!%p3142_p2)
}
  0x2f   : > { %s4097_s20 = smov 64   ;;  %s4098_s15 = smov 4  }
  0x30   : > { %2992 = dma.hbm_to_vmem [thread:$0]  (!%p3423_p8), %s447_s16, 1024, %s449_s24, %s3433_s27, %s4097_s20, %s4097_s20, %s4098_s15  }
  0x31   : > { %p2610_p3 = scmp.ge.s32.totalorder %s3293_s28, 1  ;;  %p543_p4 = scmp.lt.s32.totalorder %s3293_s28, 3 }
  0x32   : > { %s2974_s13 = smul.u32 192, %s3421_s18  ;;  %s4115_s1 = sld [smem:[#allocation18_spill]] }
  0x33   : > { %p3455_p5 = pnand %p2610_p3, %p543_p4  ;;  %s2975_s21 = smul.u32 192, %s3293_s28 }
  0x34   : > { %s411_s14 = scalar_lea.vmem [#allocation4], %s2974_s13  ;;  %s408_s12 = scalar_lea.sflag [#allocation5], %s3421_s18 }
  0x35   : > { %s419_s3 = sshll.u32 %s411_s14, 4  ;;  %s420_s3 = int_to_ptr.vmem [resolvable:$true] %s419_s3 }
  0x38   : > { %s416_s22 = scalar_lea.hbm %s4115_s1, %s2975_s21  ;;  %s3168_s10 = scalar_lea.hbm %s4115_s1, 384 }
  0x39   : > { %s417_s0 = sshll.u32 %s416_s22, 4  ;;  %s418_s0 = int_to_ptr.hbm [resolvable:$true] %s417_s0 }
  0x3a   : > { %s3161_s16 = sshra.s32 %s418_s0, 4  ;;  %s3162_s16 = int_to_ptr.hbm [resolvable:$true] %s3161_s16 }
  0x3b   : > { %s3163_s24 = scalar_lea.hbm %s3162_s16, 192  ;;  %p3169_p12 = scmp.lt.s32.totalorder %s3162_s16, %s4115_s1 }
  0x3c   : > { %p3164_p6 = scmp.ne.s32.totalorder %s3162_s16, %s3163_s24  ;;  %p3170_p13 = scmp.lt.s32.totalorder %s3168_s10, %s3163_s24 }
  0x3e   : > { %p3166_p9 = pnand %p3164_p6, %p3135_p10  ;;  %p3171_p0 = por %p3170_p13, %p3169_p12 }
  0x40   : > { %p3167_p11 = pneg %p3166_p9 }
  0x42   : > { %p3172_p1 = pnand %p3171_p0, %p3167_p11 }
  0x44   : > { %3175 = shalt.err (!%p3172_p1)
}
  0x45   : > { %s3297_s13 = smov 192   ;;  %s3298_s25 = smov 12  }
  0x46   : > { %2989 = dma.hbm_to_vmem [thread:$0]  (!%p3423_p8), %s418_s0, 3072, %s420_s3, %s408_s12, %s3297_s13, %s3297_s13, %s3298_s25  }
  0x47   : > { %s2604_s22 = sshll.u32 %s3421_s18, 7  ;;  %s2908_s14 = sshll.u32 %s3293_s28, 7 }
  0x48   : > { %s4116_s9 = sld [smem:[#allocation21_spill]]  ;;  %s492_s16 = scalar_lea.vmem [#allocation8], %s2604_s22 }
  0x49   : > { %s500_s10 = sshll.u32 %s492_s16, 4  ;;  %s501_s10 = int_to_ptr.vmem [resolvable:$true] %s500_s10 }
  0x4e   : > { %s497_s8 = scalar_lea.hbm %s4116_s9, %s2908_s14  ;;  %s3198_s12 = scalar_lea.hbm %s4116_s9, 256 }
  0x4f   : > { %s498_s23 = sshll.u32 %s497_s8, 4  ;;  %s499_s23 = int_to_ptr.hbm [resolvable:$true] %s498_s23 }
  0x50   : > { %s3191_s24 = sshra.s32 %s499_s23, 4  ;;  %s3192_s24 = int_to_ptr.hbm [resolvable:$true] %s3191_s24 }
  0x51   : > { %s3193_s21 = scalar_lea.hbm %s3192_s24, 128  ;;  %p3199_p6 = scmp.lt.s32.totalorder %s3192_s24, %s4116_s9 }
  0x52   : > { %p3194_p2 = scmp.ne.s32.totalorder %s3192_s24, %s3193_s21  ;;  %p3200_p9 = scmp.lt.s32.totalorder %s3198_s12, %s3193_s21 }
  0x54   : > { %p3196_p3 = pnand %p3194_p2, %p3135_p10  ;;  %p3201_p11 = por %p3200_p9, %p3199_p6 }
  0x56   : > { %p3197_p4 = pneg %p3196_p3 }
  0x58   : > { %p3202_p12 = pnand %p3201_p11, %p3197_p4 }
  0x5a   : > { %3205 = shalt.err (!%p3202_p12)
}
  0x5b   : > { %s3299_s8 = smov 128   ;;  %s3300_s25 = smov 8  }
  0x5c   : > { %2995 = dma.hbm_to_vmem [thread:$0]  (!%p3423_p8), %s499_s23, 2048, %s501_s10, %s3433_s27, %s3299_s8, %s3299_s8, %s3300_s25  }
  0x5d   : > { %s4117_s11 = sld [smem:[#allocation23_spill]]  ;;  %s521_s0 = scalar_lea.vmem [#allocation9], %s2604_s22 }
  0x5e   : > { %s529_s3 = sshll.u32 %s521_s0, 4  ;;  %s518_s24 = scalar_lea.sflag [#allocation10], %s3421_s18  ;;  %s530_s3 = int_to_ptr.vmem [resolvable:$true] %s529_s3 }
  0x63   : > { %s526_s16 = scalar_lea.hbm %s4117_s11, %s2908_s14  ;;  %s3228_s23 = scalar_lea.hbm %s4117_s11, 256 }
  0x64   : > { %s527_s28 = sshll.u32 %s526_s16, 4  ;;  %s528_s28 = int_to_ptr.hbm [resolvable:$true] %s527_s28 }
  0x65   : > { %s3221_s21 = sshra.s32 %s528_s28, 4  ;;  %s3222_s21 = int_to_ptr.hbm [resolvable:$true] %s3221_s21 }
  0x66   : > { %s3223_s12 = scalar_lea.hbm %s3222_s21, 128  ;;  %p3229_p2 = scmp.lt.s32.totalorder %s3222_s21, %s4117_s11 }
  0x67   : > { %p3224_p13 = scmp.ne.s32.totalorder %s3222_s21, %s3223_s12  ;;  %p3230_p3 = scmp.lt.s32.totalorder %s3228_s23, %s3223_s12 }
  0x69   : > { %p3226_p0 = pnand %p3224_p13, %p3135_p10  ;;  %p3231_p4 = por %p3230_p3, %p3229_p2 }
  0x6b   : > { %p3227_p1 = pneg %p3226_p0 }
  0x6d   : > { %p3232_p6 = pnand %p3231_p4, %p3227_p1 }
  0x6f   : > { %3235 = shalt.err (!%p3232_p6)
}
  0x70   : > { %s4118_s18 = smov 4   ;;  %s4119_s22 = smov 64  }
  0x71   : > { %2998 = dma.hbm_to_vmem [thread:$0]  (!%p3423_p8), %s528_s28, 2048, %s530_s3, %s518_s24, %s4119_s22, %s4119_s22, %s4118_s18  }
  0x72   : > { %547 = sbr.rel (%p3455_p5) target bundleno = 2216 (0x8a8), region = 72  ;;  %s549_s8 = sand.u32 (!%p3455_p5), 1, %s3285_s26  }
  0x73   : > { %s2976_s25 = smul.u32 (!%p3455_p5), 192, %s549_s8  ;;  %s550_s20 = scalar_lea.sflag (!%p3455_p5), [#allocation5], %s549_s8 }
  0x75   : > { %s3513_s15 = scalar_lea.vmem (!%p3455_p5), [#allocation4], %s2976_s25 }
  0x77   : > { %3268 = dma.done.wait (%p3416_p7), %s550_s20, 3072  }
  0x78   : > { %3270 = vsyncadd (%p3416_p7), %s550_s20, 4294964224  ;;  %s559_s19 = sand.u32 1, %s3399_s29   ;;  %s2611_s16 = sshll.u32 %s549_s8, 6 }
  0x79   : > { %s560_s0 = scalar_lea.sflag [#allocation7], %s559_s19  ;;  %s3520_s3 = scalar_lea.vmem [#allocation6], %s2611_s16 }
  0x7a   : > { %3272 = dma.done.wait (%p3416_p7), %s560_s0, 3072  }
  0x7b   : > { %3274 = vsyncadd (%p3416_p7), %s560_s0, 4294964224  ;;  %s2612_s30 = sshll.u32 %s549_s8, 7  ;;  %s580_s24 = scalar_lea.sflag [#allocation10], %s549_s8 }
  0x7c   : > { %s3526_s28 = scalar_lea.vmem [#allocation8], %s2612_s30  ;;  %s3528_s21 = scalar_lea.vmem [#allocation9], %s2612_s30 }
  0x7d   : > { %3276 = dma.done.wait (%p3416_p7), %s580_s24, 2048  }
  0x7e   : > { %3278 = vsyncadd (%p3416_p7), %s580_s24, 4294965248  ;;  %p663_p8 = scmp.lt.s32.totalorder %s3399_s29, 1  ;;  %s4120_s23 = sld [smem:[#allocation20_spill]] }
  0x7f   : > { %s4121_s18 = sld [smem:[#allocation22_spill]]  ;;  %p2615_p7 = scmp.ne.s32.totalorder %s3399_s29, 0 }
  0x80   : > { %s3536_s12 = scalar_select %p663_p8, %s3399_s29, 1 }
  0x81   : > { %s4122_s25 = sld [smem:[#allocation24_spill]] }
  0x82   : > { %s2977_s13 = smul.u32 3, %s3536_s12  ;;  %s678_s24 = scalar_lea.vmem %s4086_s7, %s3536_s12 }
  0x83   : > { %s2614_s9 = sshll.u32 %s3536_s12, 1  ;;  %693 = sbr.rel (%p2615_p7) target bundleno = 142 (0x8e), region = 92 }
  0x84   : > { %s3554_s16 = scalar_lea.vmem %s4081_s2, %s2977_s13  ;;  %s681_s10 = scalar_lea.vmem %s4120_s23, %s3536_s12 }
  0x85   : > { %s3568_s11 = scalar_lea.vmem %s4121_s18, %s2614_s9  ;;  %s4123_s0 = sld [smem:[#allocation17_spill]] (!%p2615_p7) }
  0x87   : > { %s688_s20 = scalar_lea.vmem %s4122_s25, %s3536_s12 }
  0x8b   : > { %v694_v0 = vld [vmem:[%s4123_s0] sm:$0xff]  ;;  %v695_v1 = vld [vmem:[%s4123_s0 + $0x8] sm:$0xff] }
  0x8c   : > { %696 = vst [vmem:[#allocation2] sm:$0xff] %v694_v0 }
  0x8d   : > { %697 = vst [vmem:[#allocation2 + $0x8] sm:$0xff] %v695_v1 }
  0x8e PF: > { %v2931_v2 = vld [vmem:[%s3513_s15 + $0xac] sm:$0xf]  ;;  %v2704_v3 = vld [vmem:[%s3513_s15 + $0xb4] sm:$0xf0]  ;;  %v2928_v4 = vld [vmem:[%s3513_s15 + $0x94] sm:$0xf]  ;;  %s4124_s22 = scalar_lea.vmem %s4083_s4, %s3536_s12  ;;  %s4125_s8 = scalar_lea.vmem %s4084_s5, %s3536_s12 }
  0x8f   : > { %v2707_v5 = vor.u32 %v2931_v2, %v2704_v3  ;;  %v2692_v6 = vld [vmem:[%s3513_s15 + $0x9c] sm:$0xf0]  ;;  %v2702_v7 = vld [vmem:[%s3513_s15 + $0xa8] sm:$0xf]  ;;  %v2932_v8 = vld [vmem:[%s3513_s15 + $0xb0] sm:$0xf0]  ;;  %s4126_s30 = scalar_lea.vmem %s4085_s6, %s3536_s12 }
  0x90   : > { %v2703_v9 = vor.u32 %v2932_v8, %v2702_v7  ;;  %v2690_v10 = vld [vmem:[%s3513_s15 + $0x90] sm:$0xf]  ;;  %v2695_v11 = vor.u32 %v2928_v4, %v2692_v6  ;;  %v2929_v12 = vld [vmem:[%s3513_s15 + $0x98] sm:$0xf0]  ;;  %v2680_v14 = vld [vmem:[%s3513_s15 + $0x84] sm:$0xf0] }
  0x91   : > { %883 = vmatpush.bf16.msra.mxu1 %v2707_v5  ;;  %v2925_v13 = vld [vmem:[%s3513_s15 + $0x7c] sm:$0xf]  ;;  %v2691_v15 = vor.u32 %v2929_v12, %v2690_v10  ;;  %v2678_v16 = vld [vmem:[%s3513_s15 + $0x78] sm:$0xf]  ;;  %v2926_v17 = vld [vmem:[%s3513_s15 + $0x80] sm:$0xf0] }
  0x92   : > { %869 = vmatpush.bf16.msra.mxu0 %v2703_v9  ;;  %v2683_v18 = vor.u32 %v2925_v13, %v2680_v14  ;;  %v2922_v19 = vld [vmem:[%s3513_s15 + $0x64] sm:$0xf]  ;;  %v2668_v20 = vld [vmem:[%s3513_s15 + $0x6c] sm:$0xf0]  ;;  %v2679_v21 = vor.u32 %v2926_v17, %v2678_v16  ;;  %v2666_v22 = vld [vmem:[%s3513_s15 + $0x60] sm:$0xf] }
  0x93   : > { %v2923_v23 = vld [vmem:[%s3513_s15 + $0x68] sm:$0xf0]  ;;  %v2671_v24 = vor.u32 %v2922_v19, %v2668_v20  ;;  %v2710_v26 = vld [vmem:[%s3513_s15 + $0xb0] sm:$0xf]  ;;  %v2933_v27 = vld [vmem:[%s3513_s15 + $0xb8] sm:$0xf0] }
  0x94   : > { %v2919_v25 = vld [vmem:[%s3513_s15 + $0x4c] sm:$0xf]  ;;  %v2656_v28 = vld [vmem:[%s3513_s15 + $0x54] sm:$0xf0]  ;;  %v2667_v29 = vor.u32 %v2923_v23, %v2666_v22  ;;  %v2711_v30 = vor.u32 %v2933_v27, %v2710_v26  ;;  %v2930_v32 = vld [vmem:[%s3513_s15 + $0xa0] sm:$0xf0] }
  0x95   : > { %884 = vmatpush.bf16.msra.mxu1 %v2695_v11  ;;  %v2698_v31 = vld [vmem:[%s3513_s15 + $0x98] sm:$0xf]  ;;  %v2654_v33 = vld [vmem:[%s3513_s15 + $0x48] sm:$0xf]  ;;  %v2920_v34 = vld [vmem:[%s3513_s15 + $0x50] sm:$0xf0]  ;;  %v2659_v36 = vor.u32 %v2919_v25, %v2656_v28 }
  0x96   : > { %870 = vmatpush.bf16.msra.mxu0 %v2691_v15  ;;  %897 = vmatpush.bf16.msra.mxu2 %v2711_v30  ;;  %v2699_v35 = vor.u32 %v2930_v32, %v2698_v31  ;;  %v2686_v37 = vld [vmem:[%s3513_s15 + $0x80] sm:$0xf]  ;;  %v2927_v38 = vld [vmem:[%s3513_s15 + $0x88] sm:$0xf0]  ;;  %v2916_v39 = vld [vmem:[%s3513_s15 + $0x34] sm:$0xf]  ;;  %v2655_v41 = vor.u32 %v2920_v34, %v2654_v33 }
  0x97   : > { %v2644_v40 = vld [vmem:[%s3513_s15 + $0x3c] sm:$0xf0]  ;;  %v2642_v42 = vld [vmem:[%s3513_s15 + $0x30] sm:$0xf]  ;;  %v2917_v43 = vld [vmem:[%s3513_s15 + $0x38] sm:$0xf0]  ;;  %v2687_v44 = vor.u32 %v2927_v38, %v2686_v37 }
  0x98   : > { %v2647_v45 = vor.u32 %v2916_v39, %v2644_v40  ;;  %v2674_v46 = vld [vmem:[%s3513_s15 + $0x68] sm:$0xf]  ;;  %v2924_v47 = vld [vmem:[%s3513_s15 + $0x70] sm:$0xf0]  ;;  %v2913_v48 = vld [vmem:[%s3513_s15 + $0x1c] sm:$0xf]  ;;  %v2643_v50 = vor.u32 %v2917_v43, %v2642_v42 }
  0x99   : > { %885 = vmatpush.bf16.msra.mxu1 %v2683_v18  ;;  %v2632_v49 = vld [vmem:[%s3513_s15 + $0x24] sm:$0xf0]  ;;  %v2630_v51 = vld [vmem:[%s3513_s15 + $0x18] sm:$0xf]  ;;  %v2914_v52 = vld [vmem:[%s3513_s15 + $0x20] sm:$0xf0]  ;;  %v2675_v53 = vor.u32 %v2924_v47, %v2674_v46 }
  0x9a   : > { %871 = vmatpush.bf16.msra.mxu0 %v2679_v21  ;;  %898 = vmatpush.bf16.msra.mxu2 %v2699_v35  ;;  %v2635_v54 = vor.u32 %v2913_v48, %v2632_v49  ;;  %v2662_v55 = vld [vmem:[%s3513_s15 + $0x50] sm:$0xf]  ;;  %v2921_v56 = vld [vmem:[%s3513_s15 + $0x58] sm:$0xf0]  ;;  %v2910_v57 = vld [vmem:[%s3513_s15 + $0x4] sm:$0xf]  ;;  %v2631_v59 = vor.u32 %v2914_v52, %v2630_v51 }
  0x9b   : > { %v2620_v58 = vld [vmem:[%s3513_s15 + $0xc] sm:$0xf0]  ;;  %v2618_v60 = vld [vmem:[%s3513_s15] sm:$0xf]  ;;  %v2911_v61 = vld [vmem:[%s3513_s15 + $0x8] sm:$0xf0]  ;;  %v2663_v63 = vor.u32 %v2921_v56, %v2662_v55 }
  0x9c   : > { %v698_v62 = vld [vmem:[#allocation2] sm:$0xff]  ;;  %v2623_v0 = vor.u32 %v2910_v57, %v2620_v58  ;;  %v699_v1 = vld [vmem:[#allocation2 + $0x8] sm:$0xff]  ;;  %v2650_v2 = vld [vmem:[%s3513_s15 + $0x38] sm:$0xf]  ;;  %v2619_v4 = vor.u32 %v2911_v61, %v2618_v60  ;;  %vm917_vm0 = vcmask 130048   ;;  %s3301_s9 = smov 96  }
  0x9d   : > { %886 = vmatpush.bf16.msra.mxu1 %v2671_v24  ;;  %v2918_v3 = vld [vmem:[%s3513_s15 + $0x40] sm:$0xf0]  ;;  %v700_v5 = vpack.c.bf16 %v699_v1, %v698_v62  ;;  %v2638_v7 = vld [vmem:[%s3513_s15 + $0x20] sm:$0xf]  ;;  %v2915_v8 = vld [vmem:[%s3513_s15 + $0x28] sm:$0xf0] }
  0x9e   : > { %872 = vmatpush.bf16.msra.mxu0 %v2667_v29  ;;  %899 = vmatpush.bf16.msra.mxu2 %v2687_v44  ;;  %v2651_v6 = vor.u32 %v2918_v3, %v2650_v2  ;;  %v2639_v9 = vor.u32 %v2915_v8, %v2638_v7  ;;  %v2626_v10 = vld [vmem:[%s3513_s15 + $0x8] sm:$0xf]  ;;  %v2912_v11 = vld [vmem:[%s3513_s15 + $0x10] sm:$0xf0]  ;;  %v3630_v13 = vld [vmem:[%s3554_s16] sm:$0x7] }
  0x9f   : > { %v2627_v12 = vor.u32 %v2912_v11, %v2626_v10  ;;  %v736_v14 = vperm.slane %v3630_v13, 1  ;;  %v735_v15 = vperm.slane %v3630_v13, 0  ;;  %s3302_s15 = smov 112   ;;  %s3303_s18 = smov 80   ;;  %v737_v38 = vperm.slane %v3630_v13, 2 }
  0xa0   : > { %vm984_vm1 = vcmask 1043456   ;;  %s3304_s25 = smov 64   ;;  %s3305_s16 = smov 32   ;;  %vm956_vm2 = vcmask 64512   ;;  %vm1160_vm3 = vcmask 261248   ;;  %vm1283_vm4 = vcmask 392448  }
  0xa1   : > { %887 = vmatpush.bf16.msra.mxu1 %v2659_v36  ;;  %s3306_s27 = smov 48   ;;  %s3307_s23 = smov 16   ;;  %vm1406_vm5 = vcmask 523648   ;;  %vm1529_vm6 = vcmask 654848   ;;  %vm1652_vm7 = vcmask 786048   ;;  %vm1775_vm8 = vcmask 917248  }
  0xa2   : > { %873 = vmatpush.bf16.msra.mxu0 %v2655_v41  ;;  %900 = vmatpush.bf16.msra.mxu2 %v2675_v53  ;;  %vm1898_vm9 = vcmask 1048448   ;;  %p2904_p10 = scmp.ne.s32.totalorder %s3399_s29, 1 }
  0xa5   : > { %888 = vmatpush.bf16.msra.mxu1 %v2647_v45 }
  0xa6   : > { %874 = vmatpush.bf16.msra.mxu0 %v2643_v50  ;;  %901 = vmatpush.bf16.msra.mxu2 %v2663_v63 }
  0xa9   : > { %889 = vmatpush.bf16.msra.mxu1 %v2635_v54 }
  0xaa   : > { %875 = vmatpush.bf16.msra.mxu0 %v2631_v59  ;;  %902 = vmatpush.bf16.msra.mxu2 %v2651_v6 }
  0xad   : > { %890 = vmatpush.bf16.msra.mxu1 %v2623_v0 }
  0xae   : > { %876 = vmatpush.bf16.msra.mxu0 %v2619_v4  ;;  %903 = vmatpush.bf16.msra.mxu2 %v2639_v9 }
  0xb0   : > { %891 = vmatmul.bf16.vlgmr.msra.gmra.mxu1 %v700_v5 }
  0xb1   : > { %877 = vmatmul.bf16.vlgmr.msra.gmra.mxu0 %v700_v5 }
  0xb2   : > { %904 = vmatpush.bf16.msra.mxu2 %v2627_v12 }
  0xb5   : > { %905 = vmatmul.bf16.vlgmr.msra.gmra.mxu2 %v700_v5 }
 0x12d   : > { %v892_v16 = vpop.f32.mrf.mxu1 }
 0x12e   : > { %v893_v17 = vadd.f32 %v892_v16, %v736_v14  ;;  %v878_v18 = vpop.f32.mrf.mxu0 }
 0x12f   : > { %v879_v19 = vadd.f32 %v878_v18, %v735_v15 }
 0x130   : > { %v913_v20 = vpack.c.bf16 %v893_v17, %v893_v17 }
 0x131   : > { %v911_v23 = vpack.c.bf16 %v879_v19, %v879_v19 }
 0x132   : > { %v1028_v21 = vunpack.c.l.b16 %v913_v20  ;;  %v922_v22 = vsel %vm917_vm0, %v913_v20, 0 }
 0x133   : > { %931 = vmatpush.bf16.xpose.msra.mxu3 %v922_v22  ;;  %v1023_v28 = vunpack.c.l.b16 %v911_v23 }
 0x134   : > { %v1029_v24 = vpack.c.b16 %v1028_v21, %v1028_v21 }
 0x135   : > { %v894_v25 = vpop.f32.mrf.mxu1  ;;  %v1024_v33 = vpack.c.b16 %v1023_v28, %v1023_v28 }
 0x136   : > { %v895_v26 = vadd.f32 %v894_v25, %v736_v14  ;;  %1165 = vrot.lane.b32.xlu2 %v1029_v24, %s3301_s9  ;;  %1030 = vrot.lane.b32.xlu0 %v1029_v24, %s3302_s15  ;;  %v880_v27 = vpop.f32.mrf.mxu0 }
 0x137   : > { %v881_v30 = vadd.f32 %v880_v27, %v735_v15 }
 0x138   : > { %v914_v29 = vpack.c.bf16 %v895_v26, %v895_v26  ;;  %v906_v39 = vpop.f32.mrf.mxu2 }
 0x139   : > { %v912_v35 = vpack.c.bf16 %v881_v30, %v881_v30  ;;  %v907_v40 = vadd.f32 %v906_v39, %v737_v38 }
 0x13a   : > { %v1057_v31 = vunpack.c.l.b16 %v914_v29  ;;  %2712 = vmatmul.msk.bf16.vlgmr.msra.gmra.mxu3 %vm917_vm0, %v911_v23  ;;  %v941_v32 = vsel %vm917_vm0, %v914_v29, 0 }
 0x13b   : > { %950 = vmatpush.bf16.xpose.msrb.mxu3 %v941_v32  ;;  %v1052_v36 = vunpack.c.l.b16 %v912_v35  ;;  %v915_v41 = vpack.c.bf16 %v907_v40, %v907_v40 }
 0x13c   : > { %v1058_v34 = vpack.c.b16 %v1057_v31, %v1057_v31 }
 0x13d   : > { %v1053_v37 = vpack.c.b16 %v1052_v36, %v1052_v36  ;;  %v986_v42 = vsel %vm984_vm1, %v915_v41, 0  ;;  %v1105_v43 = vunpack.c.l.b16 %v915_v41 }
 0x13e   : > { %1059 = vrot.lane.b32.xlu1 %v1058_v34, %s3302_s15  ;;  %1188 = vrot.lane.b32.xlu2 %v1058_v34, %s3301_s9 }
 0x13f   : > { %1025 = vrot.lane.b32.xlu0 %v1024_v33, %s3302_s15  ;;  %v3663_v44 = vpack.c.b16 %v1105_v43, %v1105_v43 }
 0x140   : > { %v908_v45 = vpop.f32.mrf.mxu2 }
 0x141   : > { %v909_v46 = vadd.f32 %v908_v45, %v737_v38 }
 0x143   : > { %995 = vmatpush.bf16.msra.mxu3 %v986_v42  ;;  %v916_v47 = vpack.c.bf16 %v909_v46, %v909_v46 }
 0x145   : > { %v1129_v48 = vunpack.c.l.b16 %v916_v47  ;;  %v1005_v52 = vsel %vm984_vm1, %v916_v47, 0 }
 0x146   : > { %1288 = vrot.lane.b32.xlu2 %v1029_v24, %s3303_s18  ;;  %1054 = vrot.lane.b32.xlu1 %v1053_v37, %s3302_s15 }
 0x147   : > { %1163 = vrot.lane.b32.xlu0 %v1024_v33, %s3301_s9  ;;  %v3673_v49 = vpack.c.b16 %v1129_v48, %v1129_v48  ;;  %1014 = vmatpush.bf16.msrb.mxu0 %v1005_v52 }
 0x14a   : > { %2713 = vmatmul.msk.bf16.vlgmr.msrb.gmra.mxu3 %vm917_vm0, %v912_v35 }
 0x14e   : > { %1309 = vrot.lane.b32.xlu2 %v1053_v37, %s3303_s18  ;;  %1186 = vrot.lane.b32.xlu1 %v1053_v37, %s3301_s9 }
 0x14f   : > { %1311 = vrot.lane.b32.xlu0 %v1058_v34, %s3303_s18 }
 0x156   : > { %1409 = vrot.lane.b32.xlu2 %v1024_v33, %s3304_s25  ;;  %1286 = vrot.lane.b32.xlu1 %v1024_v33, %s3303_s18 }
 0x157   : > { %1411 = vrot.lane.b32.xlu0 %v1029_v24, %s3304_s25 }
 0x15e   : > { %1657 = vrot.lane.b32.xlu2 %v1029_v24, %s3305_s16  ;;  %1534 = vrot.lane.b32.xlu1 %v1029_v24, %s3306_s27 }
 0x15f   : > { %1432 = vrot.lane.b32.xlu0 %v1053_v37, %s3304_s25 }
 0x166   : > { %1557 = vrot.lane.b32.xlu2 %v1058_v34, %s3306_s27  ;;  %1434 = vrot.lane.b32.xlu1 %v1058_v34, %s3304_s25 }
 0x167   : > { %1532 = vrot.lane.b32.xlu0 %v1024_v33, %s3306_s27 }
 0x16e   : > { %1778 = vrot.lane.b32.xlu2 %v1024_v33, %s3307_s23  ;;  %1655 = vrot.lane.b32.xlu1 %v1024_v33, %s3305_s16 }
 0x16f   : > { %1780 = vrot.lane.b32.xlu0 %v1029_v24, %s3307_s23 }
 0x176   : > { %1107 = vrot.lane.b32.xlu2 %v3663_v44, %s3302_s15  ;;  %1555 = vrot.lane.b32.xlu1 %v1053_v37, %s3306_s27 }
 0x177   : > { %1680 = vrot.lane.b32.xlu0 %v1058_v34, %s3305_s16 }
 0x17e   : > { %1678 = vrot.lane.b32.xlu2 %v1053_v37, %s3305_s16  ;;  %1803 = vrot.lane.b32.xlu1 %v1058_v34, %s3307_s23 }
 0x17f   : > { %1233 = vrot.lane.b32.xlu0 %v3663_v44, %s3301_s9 }
 0x186   : > { %1131 = vrot.lane.b32.xlu1 %v3673_v49, %s3302_s15 }
 0x187   : > { %1801 = vrot.lane.b32.xlu0 %v1053_v37, %s3307_s23 }
 0x18f   : > { %1254 = vrot.lane.b32.xlu0 %v3673_v49, %s3301_s9 }
 0x190   : > { %v1166_v50 = vpop.permute.xlu2 %1165 }
 0x191   : > { %v1171_v51 = vsel %vm917_vm0, %v1166_v50, 0 }
 0x192   : > { %1180 = vmatpush.bf16.xpose.msrb.mxu1 %v1171_v51 }
 0x198   : > { %v1189_v53 = vpop.permute.xlu2 %1188 }
 0x199   : > { %v1194_v63 = vsel %vm917_vm0, %v1189_v53, 0 }
 0x1a0   : > { %v1289_v54 = vpop.permute.xlu2 %1288 }
 0x1a1   : > { %v1294_v55 = vsel %vm917_vm0, %v1289_v54, 0 }
 0x1a2   : > { %1303 = vmatpush.bf16.xpose.msra.mxu1 %v1294_v55 }
 0x1a8   : > { %v1031_v56 = vpop.permute.xlu0 %1030  ;;  %v1310_v57 = vpop.permute.xlu2 %1309 }
 0x1a9   : > { %v1036_v58 = vsel %vm917_vm0, %v1031_v56, 0 }
 0x1aa   : > { %1045 = vmatpush.bf16.xpose.msrb.mxu2 %v1036_v58 }
 0x1b0   : > { %v1060_v59 = vpop.permute.xlu1 %1059  ;;  %v1410_v60 = vpop.permute.xlu2 %1409 }
 0x1b1   : > { %v1065_v61 = vsel %vm917_vm0, %v1060_v59, 0  ;;  %v1026_v62 = vpop.permute.xlu0 %1025 }
 0x1b2   : > { %2716 = vmatmul.msk.bf16.vlgmr.msrb.gmra.mxu2 %vm917_vm0, %v1026_v62 }
 0x1b3   : > { %1074 = vmatpush.bf16.xpose.msra.mxu2 %v1065_v61 }
 0x1b8   : > { %v1055_v0 = vpop.permute.xlu1 %1054  ;;  %v1658_v1 = vpop.permute.xlu2 %1657 }
 0x1b9   : > { %v1164_v2 = vpop.permute.xlu0 %1163  ;;  %v1663_v24 = vsel %vm917_vm0, %v1658_v1, 0 }
 0x1ba   : > { %2720 = vmatmul.msk.bf16.vlgmr.msrb.gmra.mxu1 %vm917_vm0, %v1164_v2 }
 0x1bb   : > { %1203 = vmatpush.bf16.xpose.msrb.mxu2 %v1194_v63 }
 0x1bd   : > { %v3688_v3 = vpop.f32.mrf.mxu3 }
 0x1be   : > { %v957_v4 = vsel %vm956_vm2, %v3688_v3, -inf }
 0x1bf   : > { %958 = vmax.xlane.f32.xlu1 %v957_v4 }
 0x1c0   : > { %v1187_v5 = vpop.permute.xlu1 %1186  ;;  %v1558_v6 = vpop.permute.xlu2 %1557 }
 0x1c1   : > { %v1312_v7 = vpop.permute.xlu0 %1311  ;;  %v1563_v26 = vsel %vm917_vm0, %v1558_v6, 0 }
 0x1c2   : > { %v1317_v8 = vsel %vm917_vm0, %v1312_v7, 0  ;;  %2717 = vmatmul.msk.bf16.vlgmr.msra.gmra.mxu2 %vm917_vm0, %v1055_v0 }
 0x1c3   : > { %1326 = vmatpush.bf16.xpose.msra.mxu2 %v1317_v8 }
 0x1c5   : > { %v935_v9 = vpop.f32.mrf.mxu3 }
 0x1c8   : > { %v1779_v10 = vpop.permute.xlu2 %1778  ;;  %v1287_v11 = vpop.permute.xlu1 %1286 }
 0x1c9   : > { %v1412_v12 = vpop.permute.xlu0 %1411 }
 0x1ca   : > { %v1417_v13 = vsel %vm917_vm0, %v1412_v12, 0  ;;  %2724 = vmatmul.msk.bf16.vlgmr.msra.gmra.mxu1 %vm917_vm0, %v1287_v11 }
 0x1cb   : > { %1426 = vmatpush.bf16.xpose.msrb.mxu1 %v1417_v13 }
 0x1cd   : > { %v3696_v14 = vpop.f32.mrf.mxu3 }
 0x1ce   : > { %v960_v15 = vsel %vm956_vm2, %v3696_v14, -inf }
 0x1cf   : > { %961 = vmax.xlane.f32.xlu2 %v960_v15 }
 0x1d0   : > { %v1108_v16 = vpop.permute.xlu2 %1107  ;;  %v1535_v17 = vpop.permute.xlu1 %1534 }
 0x1d1   : > { %v1113_v18 = vsel %vm984_vm1, %v1108_v16, 0  ;;  %v1540_v19 = vsel %vm917_vm0, %v1535_v17, 0  ;;  %v1433_v20 = vpop.permute.xlu0 %1432 }
 0x1d2   : > { %2721 = vmatmul.msk.bf16.vlgmr.msrb.gmra.mxu2 %vm917_vm0, %v1187_v5  ;;  %1122 = vmatpush.bf16.msrb.mxu3 %v1113_v18 }
 0x1d3   : > { %1549 = vmatpush.bf16.xpose.msra.mxu1 %v1540_v19 }
 0x1d5   : > { %v954_v21 = vpop.f32.mrf.mxu3 }
 0x1d8   : > { %v1435_v22 = vpop.permute.xlu1 %1434  ;;  %1377 = vrot.lane.b32.xlu1 %v3673_v49, %s3303_s18  ;;  %v1679_v37 = vpop.permute.xlu2 %1678 }
 0x1d9   : > { %v1440_v23 = vsel %vm917_vm0, %v1435_v22, 0  ;;  %v1533_v25 = vpop.permute.xlu0 %1532 }
 0x1da   : > { %2728 = vmatmul.msk.bf16.vlgmr.msrb.gmra.mxu1 %vm917_vm0, %v1410_v60  ;;  %1449 = vmatpush.bf16.xpose.msrb.mxu2 %v1440_v23 }
 0x1db   : > { %1672 = vmatpush.bf16.xpose.msrb.mxu1 %v1663_v24 }
 0x1e0   : > { %1479 = vrot.lane.b32.xlu1 %v3663_v44, %s3304_s25  ;;  %v1656_v28 = vpop.permute.xlu1 %1655 }
 0x1e1   : > { %v1781_v27 = vpop.permute.xlu0 %1780 }
 0x1e2   : > { %2725 = vmatmul.msk.bf16.vlgmr.msra.gmra.mxu2 %vm917_vm0, %v1310_v57  ;;  %v1786_v29 = vsel %vm917_vm0, %v1781_v27, 0 }
 0x1e3   : > { %1572 = vmatpush.bf16.xpose.msra.mxu2 %v1563_v26 }
 0x1e7   : > { %1356 = vrot.lane.b32.xlu2 %v3663_v44, %s3303_s18 }
 0x1e8   : > { %v1556_v31 = vpop.permute.xlu1 %1555 }
 0x1e9   : > { %v1681_v30 = vpop.permute.xlu0 %1680 }
 0x1ea   : > { %2732 = vmatmul.msk.bf16.vlgmr.msra.gmra.mxu1 %vm917_vm0, %v1533_v25  ;;  %v1686_v32 = vsel %vm917_vm0, %v1681_v30, 0 }
 0x1eb   : > { %1795 = vmatpush.bf16.xpose.msra.mxu1 %v1786_v29 }
 0x1f0   : > { %v1804_v33 = vpop.permute.xlu1 %1803 }
 0x1f1   : > { %v1809_v34 = vsel %vm917_vm0, %v1804_v33, 0  ;;  %v3724_v38 = vpop.permute.xlu0 %1233 }
 0x1f2   : > { %2729 = vmatmul.msk.bf16.vlgmr.msrb.gmra.mxu2 %vm917_vm0, %v1433_v20 }
 0x1f3   : > { %1695 = vmatpush.bf16.xpose.msrb.mxu2 %v1686_v32 }
 0x1f8   : > { %v1132_v35 = vpop.permute.xlu1 %1131 }
 0x1f9   : > { %v1137_v36 = vsel %vm984_vm1, %v1132_v35, 0  ;;  %v1802_v39 = vpop.permute.xlu0 %1801 }
 0x1fa   : > { %2736 = vmatmul.msk.bf16.vlgmr.msrb.gmra.mxu1 %vm917_vm0, %v1656_v28  ;;  %1146 = vmatpush.bf16.msra.mxu0 %v1137_v36 }
 0x201   : > { %v3793_v28 = vpop.permute.xlu0 %1254 }
 0x202   : > { %2733 = vmatmul.msk.bf16.vlgmr.msra.gmra.mxu2 %vm917_vm0, %v1556_v31 }
 0x203   : > { %1818 = vmatpush.bf16.xpose.msra.mxu2 %v1809_v34 }
 0x20a   : > { %2740 = vmatmul.msk.bf16.vlgmr.msra.gmra.mxu1 %vm917_vm0, %v1779_v10 }
 0x212   : > { %2737 = vmatmul.msk.bf16.vlgmr.msrb.gmra.mxu2 %vm917_vm0, %v1679_v37 }
 0x222   : > { %2741 = vmatmul.msk.bf16.vlgmr.msra.gmra.mxu2 %vm917_vm0, %v1802_v39 }
 0x232   : > { %v959_v40 = vpop.xlane.xlu1 %958 }
 0x233   : > { %v963_v41 = vsub.f32 %v3688_v3, %v959_v40 }
 0x235   : > { %v965_v42 = vmul.f32 1.442695, %v963_v41  ;;  %v3728_v43 = vpop.f32.mrf.mxu2 }
 0x236   : > { %v1080_v45 = vsel %vm956_vm2, %v3728_v43, -inf }
 0x237   : > { %3053 = vpow2.f32 %v965_v42  ;;  %1081 = vmax.xlane.f32.xlu0 %v1080_v45  ;;  %v3732_v46 = vpop.f32.mrf.mxu1 }
 0x238   : > { %v1209_v47 = vsel %vm956_vm2, %v3732_v46, -inf }
 0x239   : > { %1210 = vmax.xlane.f32.xlu1 %v1209_v47 }
 0x23d   : > { %v3736_v48 = vpop.eup %3053  ;;  %v1049_v50 = vpop.f32.mrf.mxu2 }
 0x23e   : > { %v969_v51 = vsel %vm956_vm2, %v3736_v48, 0.0 }
 0x23f   : > { %v1184_v52 = vpop.f32.mrf.mxu1 }
 0x241   : > { %970 = vadd.xlane.f32.xlu1 %v969_v51 }
 0x242   : > { %v962_v3 = vpop.xlane.xlu2 %961 }
 0x243   : > { %v964_v4 = vsub.f32 %v3696_v14, %v962_v3 }
 0x245   : > { %v3740_v53 = vpop.f32.mrf.mxu2  ;;  %v967_v6 = vmul.f32 1.442695, %v964_v4 }
 0x246   : > { %v1083_v54 = vsel %vm956_vm2, %v3740_v53, -inf }
 0x247   : > { %v3744_v55 = vpop.f32.mrf.mxu1  ;;  %1084 = vmax.xlane.f32.xlu2 %v1083_v54  ;;  %3055 = vpow2.f32 %v967_v6 }
 0x248   : > { %v1332_v8 = vsel %vm956_vm2, %v3744_v55, -inf }
 0x24a   : > { %v3791_v26 = vpop.permute.xlu1 %1377  ;;  %v3803_v40 = vpop.permute.xlu2 %1356 }
 0x24b   : > { %1500 = vrot.lane.b32.xlu0 %v3673_v49, %s3304_s25 }
 0x24d   : > { %v1078_v56 = vpop.f32.mrf.mxu2  ;;  %v3771_v12 = vpop.eup %3055 }
 0x24e   : > { %v972_v13 = vsel %vm956_vm2, %v3771_v12, 0.0 }
 0x24f   : > { %v1307_v57 = vpop.f32.mrf.mxu1 }
 0x250   : > { %v1239_v57 = vsel %vm984_vm1, %v3724_v38, 0 }
 0x252   : > { %v3795_v29 = vpop.permute.xlu1 %1479 }
 0x255   : > { %v3748_v58 = vpop.f32.mrf.mxu2 }
 0x256   : > { %v1212_v59 = vsel %vm956_vm2, %v3748_v58, -inf }
 0x257   : > { %v3752_v60 = vpop.f32.mrf.mxu1  ;;  %1213 = vmax.xlane.f32.xlu2 %v1212_v59 }
 0x258   : > { %v1455_v61 = vsel %vm956_vm2, %v3752_v60, -inf }
 0x259   : > { %1456 = vmax.xlane.f32.xlu1 %v1455_v61 }
 0x25d   : > { %v1207_v62 = vpop.f32.mrf.mxu2 }
 0x25f   : > { %v1430_v63 = vpop.f32.mrf.mxu1 }
 0x265   : > { %v3756_v0 = vpop.f32.mrf.mxu2 }
 0x266   : > { %v1335_v1 = vsel %vm956_vm2, %v3756_v0, -inf }
 0x267   : > { %v3760_v2 = vpop.f32.mrf.mxu1  ;;  %1336 = vmax.xlane.f32.xlu2 %v1335_v1 }
 0x268   : > { %v1578_v16 = vsel %vm956_vm2, %v3760_v2, -inf }
 0x26d   : > { %v1330_v5 = vpop.f32.mrf.mxu2 }
 0x26f   : > { %v1553_v7 = vpop.f32.mrf.mxu1 }
 0x275   : > { %1333 = vmax.xlane.f32.xlu0 %v1332_v8  ;;  %v3765_v9 = vpop.f32.mrf.mxu2 }
 0x276   : > { %v1458_v20 = vsel %vm956_vm2, %v3765_v9, -inf }
 0x277   : > { %v3767_v10 = vpop.f32.mrf.mxu1 }
 0x278   : > { %v1701_v11 = vsel %vm956_vm2, %v3767_v10, -inf }
 0x279   : > { %1702 = vmax.xlane.f32.xlu1 %v1701_v11 }
 0x27d   : > { %v1453_v14 = vpop.f32.mrf.mxu2  ;;  %973 = vadd.xlane.f32.xlu0 %v972_v13 }
 0x27f   : > { %v1676_v15 = vpop.f32.mrf.mxu1 }
 0x285   : > { %v3777_v17 = vpop.f32.mrf.mxu2  ;;  %1579 = vmax.xlane.f32.xlu0 %v1578_v16 }
 0x286   : > { %v1581_v23 = vsel %vm956_vm2, %v3777_v17, -inf }
 0x287   : > { %v3779_v18 = vpop.f32.mrf.mxu1 }
 0x288   : > { %v1824_v19 = vsel %vm956_vm2, %v3779_v18, -inf }
 0x289   : > { %1825 = vmax.xlane.f32.xlu1 %v1824_v19 }
 0x28d   : > { %v1576_v21 = vpop.f32.mrf.mxu2  ;;  %1459 = vmax.xlane.f32.xlu0 %v1458_v20 }
 0x28f   : > { %v1799_v22 = vpop.f32.mrf.mxu1 }
 0x290   : > { %v1260_v22 = vsel %vm984_vm1, %v3793_v28, 0 }
 0x295   : > { %v3787_v24 = vpop.f32.mrf.mxu2  ;;  %1582 = vmax.xlane.f32.xlu0 %v1581_v23 }
 0x296   : > { %v1704_v25 = vsel %vm956_vm2, %v3787_v24, -inf }
 0x297   : > { %1705 = vmax.xlane.f32.xlu2 %v1704_v25 }
 0x29d   : > { %v1699_v27 = vpop.f32.mrf.mxu2 }
 0x2a5   : > { %v3797_v30 = vpop.f32.mrf.mxu2 }
 0x2a6   : > { %v1827_v31 = vsel %vm956_vm2, %v3797_v30, -inf }
 0x2a7   : > { %1828 = vmax.xlane.f32.xlu2 %v1827_v31 }
 0x2aa   : > { %v1082_v32 = vpop.xlane.xlu0 %1081 }
 0x2ab   : > { %v1086_v33 = vsub.f32 %v3728_v43, %v1082_v32 }
 0x2ac   : > { %v1211_v34 = vpop.xlane.xlu1 %1210 }
 0x2ad   : > { %v1088_v35 = vmul.f32 1.442695, %v1086_v33  ;;  %v1215_v36 = vsub.f32 %v3732_v46, %v1211_v34  ;;  %v1822_v37 = vpop.f32.mrf.mxu2 }
 0x2af   : > { %3057 = vpow2.f32 %v1088_v35  ;;  %v1217_v39 = vmul.f32 1.442695, %v1215_v36 }
 0x2b1   : > { %3059 = vpow2.f32 %v1217_v39 }
 0x2b4   : > { %v971_v41 = vpop.xlane.xlu1 %970 }
 0x2b5   : > { %v3805_v42 = vpop.eup %3057  ;;  %3061 = vrcp.f32 %v971_v41 }
 0x2b6   : > { %v1092_v45 = vsel %vm956_vm2, %v3805_v42, 0.0 }
 0x2b7   : > { %v3809_v47 = vpop.eup %3059  ;;  %1093 = vadd.xlane.f32.xlu2 %v1092_v45 }
 0x2b8   : > { %v1221_v43 = vsel %vm956_vm2, %v3809_v47, 0.0 }
 0x2b9   : > { %1222 = vadd.xlane.f32.xlu0 %v1221_v43 }
 0x2ba   : > { %v1085_v46 = vpop.xlane.xlu2 %1084 }
 0x2bb   : > { %v3062_v50 = vpop.eup %3061  ;;  %v1087_v51 = vsub.f32 %v3740_v53, %v1085_v46 }
 0x2bc   : > { %v977_v52 = vmul.f32 %v3062_v50, %v3736_v48 }
 0x2bd   : > { %v1090_v54 = vmul.f32 1.442695, %v1087_v51  ;;  %v3827_v38 = vpop.permute.xlu0 %1500 }
 0x2be   : > { %v979_v56 = vpack.c.bf16 %v977_v52, %v977_v52 }
 0x2bf   : > { %3063 = vpow2.f32 %v1090_v54 }
 0x2c0   : > { %2714 = vmatmul.msk.bf16.vlgmr.msra.gmra.mxu3 %vm956_vm2, %v979_v56 }
 0x2c1   : > { %1248 = vmatpush.bf16.msra.mxu3 %v1239_v57 }
 0x2c5   : > { %v3818_v59 = vpop.eup %3063 }
 0x2c6   : > { %v1095_v61 = vsel %vm956_vm2, %v3818_v59, 0.0 }
 0x2c7   : > { %1096 = vadd.xlane.f32.xlu1 %v1095_v61 }
 0x2ca   : > { %v1214_v62 = vpop.xlane.xlu2 %1213 }
 0x2cb   : > { %v1216_v53 = vsub.f32 %v3748_v58, %v1214_v62 }
 0x2cc   : > { %v1457_v3 = vpop.xlane.xlu1 %1456 }
 0x2cd   : > { %v1219_v63 = vmul.f32 1.442695, %v1216_v53  ;;  %v1461_v6 = vsub.f32 %v3752_v60, %v1457_v3  ;;  %v1362_v3 = vsel %vm984_vm1, %v3803_v40, 0 }
 0x2cf   : > { %3065 = vpow2.f32 %v1219_v63  ;;  %v1463_v7 = vmul.f32 1.442695, %v1461_v6 }
 0x2d5   : > { %v3823_v48 = vpop.eup %3065 }
 0x2d6   : > { %v1224_v1 = vsel %vm956_vm2, %v3823_v48, 0.0 }
 0x2d7   : > { %1225 = vadd.xlane.f32.xlu2 %v1224_v1 }
 0x2da   : > { %v1337_v23 = vpop.xlane.xlu2 %1336 }
 0x2db   : > { %v1339_v25 = vsub.f32 %v3756_v0, %v1337_v23 }
 0x2dd   : > { %v1342_v32 = vmul.f32 1.442695, %v1339_v25 }
 0x2e0   : > { %1623 = vrot.lane.b32.xlu1 %v3673_v49, %s3306_s27 }
 0x2e8   : > { %v1334_v4 = vpop.xlane.xlu0 %1333 }
 0x2e9   : > { %v1338_v5 = vsub.f32 %v3744_v55, %v1334_v4 }
 0x2eb   : > { %v1340_v58 = vmul.f32 1.442695, %v1338_v5 }
 0x2ed   : > { %3067 = vpow2.f32 %v1340_v58 }
 0x2ef   : > { %1602 = vrot.lane.b32.xlu2 %v3663_v44, %s3306_s27 }
 0x2f0   : > { %v974_v8 = vpop.xlane.xlu0 %973 }
 0x2f1   : > { %3069 = vrcp.f32 %v974_v8 }
 0x2f2   : > { %3071 = vpow2.f32 %v1463_v7 }
 0x2f3   : > { %v3835_v11 = vpop.eup %3067 }
 0x2f4   : > { %v1344_v13 = vsel %vm956_vm2, %v3835_v11, 0.0 }
 0x2f5   : > { %1345 = vadd.xlane.f32.xlu0 %v1344_v13  ;;  %v1383_v13 = vsel %vm984_vm1, %v3791_v26, 0 }
 0x2f7   : > { %v3070_v14 = vpop.eup %3069 }
 0x2f8   : > { %v1580_v15 = vpop.xlane.xlu0 %1579  ;;  %v3839_v55 = vpop.eup %3071  ;;  %v978_v60 = vmul.f32 %v3070_v14, %v3771_v12 }
 0x2f9   : > { %v1584_v16 = vsub.f32 %v3760_v2, %v1580_v15  ;;  %v1467_v21 = vsel %vm956_vm2, %v3839_v55, 0.0  ;;  %v1703_v2 = vpop.xlane.xlu1 %1702 }
 0x2fa   : > { %v980_v19 = vpack.c.bf16 %v978_v60, %v978_v60  ;;  %v1707_v34 = vsub.f32 %v3767_v10, %v1703_v2 }
 0x2fb   : > { %v1586_v20 = vmul.f32 1.442695, %v1584_v16 }
 0x2fc   : > { %2715 = vmatmul.msk.bf16.vlgmr.msrb.gmra.mxu0 %vm956_vm2, %v980_v19  ;;  %v1709_v0 = vmul.f32 1.442695, %v1707_v34 }
 0x2fd   : > { %1468 = vadd.xlane.f32.xlu0 %v1467_v21  ;;  %1269 = vmatpush.bf16.msrb.mxu0 %v1260_v22  ;;  %3073 = vpow2.f32 %v1586_v20  ;;  %v1506_v20 = vsel %vm984_vm1, %v3827_v38, 0 }
 0x300   : > { %v1460_v27 = vpop.xlane.xlu0 %1459 }
 0x301   : > { %v1462_v12 = vsub.f32 %v3765_v9, %v1460_v27  ;;  %v1826_v62 = vpop.xlane.xlu1 %1825 }
 0x303   : > { %v1465_v31 = vmul.f32 1.442695, %v1462_v12  ;;  %v3850_v33 = vpop.eup %3073 }
 0x304   : > { %v1590_v36 = vsel %vm956_vm2, %v3850_v33, 0.0 }
 0x305   : > { %3075 = vpow2.f32 %v1465_v31 }
 0x306   : > { %3077 = vpow2.f32 %v1342_v32 }
 0x308   : > { %v1583_v28 = vpop.xlane.xlu0 %1582 }
 0x309   : > { %v1585_v35 = vsub.f32 %v3777_v17, %v1583_v28 }
 0x30a   : > { %1591 = vadd.xlane.f32.xlu1 %v1590_v36  ;;  %v1706_v37 = vpop.xlane.xlu2 %1705 }
 0x30b   : > { %v3856_v39 = vpop.eup %3075  ;;  %v1588_v9 = vmul.f32 1.442695, %v1585_v35  ;;  %v1708_v41 = vsub.f32 %v3787_v24, %v1706_v37 }
 0x30c   : > { %v1470_v45 = vsel %vm956_vm2, %v3856_v39, 0.0  ;;  %v3861_v10 = vpop.eup %3077 }
 0x30d   : > { %3079 = vpow2.f32 %v1588_v9  ;;  %1471 = vadd.xlane.f32.xlu0 %v1470_v45  ;;  %v1711_v17 = vmul.f32 1.442695, %v1708_v41  ;;  %v1347_v43 = vsel %vm956_vm2, %v3861_v10, 0.0 }
 0x30e   : > { %3081 = vpow2.f32 %v1709_v0 }
 0x30f   : > { %3083 = vpow2.f32 %v1711_v17 }
 0x312   : > { %1348 = vadd.xlane.f32.xlu1 %v1347_v43 }
 0x313   : > { %v3865_v46 = vpop.eup %3079 }
 0x314   : > { %v3867_v50 = vpop.eup %3081  ;;  %v1593_v24 = vsel %vm956_vm2, %v3865_v46, 0.0 }
 0x315   : > { %1594 = vadd.xlane.f32.xlu0 %v1593_v24  ;;  %v1713_v51 = vsel %vm956_vm2, %v3867_v50, 0.0  ;;  %v3873_v52 = vpop.eup %3083 }
 0x316   : > { %v1716_v54 = vsel %vm956_vm2, %v3873_v52, 0.0 }
 0x318   : > { %1714 = vadd.xlane.f32.xlu2 %v1713_v51 }
 0x31a   : > { %v1829_v56 = vpop.xlane.xlu2 %1828 }
 0x31d   : > { %1717 = vadd.xlane.f32.xlu0 %v1716_v54 }
 0x32a   : > { %v1094_v57 = vpop.xlane.xlu2 %1093 }
 0x32b   : > { %3085 = vrcp.f32 %v1094_v57  ;;  %1746 = vrot.lane.b32.xlu1 %v3673_v49, %s3305_s16 }
 0x32c   : > { %v1223_v1 = vpop.xlane.xlu0 %1222 }
 0x32d   : > { %3087 = vrcp.f32 %v1223_v1 }
 0x330   : > { %1848 = vrot.lane.b32.xlu2 %v3663_v44, %s3307_s23 }
 0x331   : > { %v3086_v61 = vpop.eup %3085  ;;  %1725 = vrot.lane.b32.xlu0 %v3663_v44, %s3305_s16 }
 0x332   : > { %v1100_v53 = vmul.f32 %v3086_v61, %v3805_v42  ;;  %v1830_v42 = vsub.f32 %v3779_v18, %v1826_v62  ;;  %v1831_v18 = vsub.f32 %v3797_v30, %v1829_v56 }
 0x333   : > { %v3088_v5 = vpop.eup %3087 }
 0x334   : > { %v1102_v63 = vpack.c.bf16 %v1100_v53, %v1100_v53  ;;  %v1229_v44 = vmul.f32 %v3088_v5, %v3809_v47  ;;  %v1832_v14 = vmul.f32 1.442695, %v1830_v42  ;;  %v1834_v15 = vmul.f32 1.442695, %v1831_v18 }
 0x336   : > { %2718 = vmatmul.msk.bf16.vlgmr.msrb.gmra.mxu3 %vm956_vm2, %v1102_v63  ;;  %v1231_v8 = vpack.c.bf16 %v1229_v44, %v1229_v44 }
 0x337   : > { %1371 = vmatpush.bf16.msrb.mxu3 %v1362_v3 }
 0x338   : > { %1869 = vrot.lane.b32.xlu2 %v3673_v49, %s3307_s23  ;;  %v1485_v49 = vsel %vm984_vm1, %v3795_v29, 0 }
 0x33a   : > { %v1097_v4 = vpop.xlane.xlu1 %1096 }
 0x33b   : > { %3089 = vrcp.f32 %v1097_v4 }
 0x33c   : > { %3091 = vpow2.f32 %v1832_v14 }
 0x341   : > { %v3090_v6 = vpop.eup %3089 }
 0x342   : > { %v1101_v58 = vmul.f32 %v3090_v6, %v3818_v59  ;;  %v3900_v60 = vpop.eup %3091 }
 0x343   : > { %v997_v7 = vpop.f32.mrf.mxu3  ;;  %v1836_v19 = vsel %vm956_vm2, %v3900_v60, 0.0 }
 0x344   : > { %v1103_v40 = vpack.c.bf16 %v1101_v58, %v1101_v58  ;;  %1020 = vst.msk [vmem:[#allocation3] sm:$0xff] %vm917_vm0, %v997_v7 }
 0x346   : > { %2719 = vmatmul.msk.bf16.vlgmr.msra.gmra.mxu0 %vm956_vm2, %v1103_v40  ;;  %2722 = vmatmul.msk.bf16.vlgmr.msra.gmra.mxu3 %vm956_vm2, %v1231_v8 }
 0x347   : > { %1392 = vmatpush.bf16.msra.mxu0 %v1383_v13  ;;  %1494 = vmatpush.bf16.msra.mxu3 %v1485_v49 }
 0x34a   : > { %v1226_v47 = vpop.xlane.xlu2 %1225 }
 0x34b   : > { %3093 = vrcp.f32 %v1226_v47  ;;  %v999_v59 = vpop.f32.mrf.mxu3 }
 0x34c   : > { %3095 = vpow2.f32 %v1834_v15 }
 0x351   : > { %v3094_v26 = vpop.eup %3093 }
 0x352   : > { %v1230_v29 = vmul.f32 %v3094_v26, %v3823_v48  ;;  %v3908_v30 = vpop.eup %3095  ;;  %v1603_v25 = vpop.permute.xlu2 %1602 }
 0x353   : > { %v1839_v21 = vsel %vm956_vm2, %v3908_v30, 0.0  ;;  %v1608_v2 = vsel %vm984_vm1, %v1603_v25, 0  ;;  %v1624_v38 = vpop.permute.xlu1 %1623 }
 0x354   : > { %v1232_v16 = vpack.c.bf16 %v1230_v29, %v1230_v29  ;;  %v1629_v43 = vsel %vm984_vm1, %v1624_v38, 0 }
 0x355   : > { %1837 = vadd.xlane.f32.xlu1 %v1836_v19 }
 0x356   : > { %2723 = vmatmul.msk.bf16.vlgmr.msrb.gmra.mxu0 %vm956_vm2, %v1232_v16 }
 0x357   : > { %1515 = vmatpush.bf16.msrb.mxu0 %v1506_v20 }
 0x35b   : > { %1840 = vadd.xlane.f32.xlu0 %v1839_v21 }
 0x368   : > { %v1346_v22 = vpop.xlane.xlu0 %1345 }
 0x369   : > { %3097 = vrcp.f32 %v1346_v22 }
 0x36f   : > { %v3098_v48 = vpop.eup %3097 }
 0x370   : > { %v1352_v23 = vmul.f32 %v3098_v48, %v3835_v11  ;;  %v1469_v12 = vpop.xlane.xlu0 %1468 }
 0x371   : > { %3099 = vrcp.f32 %v1469_v12 }
 0x372   : > { %v1354_v27 = vpack.c.bf16 %v1352_v23, %v1352_v23 }
 0x374   : > { %2726 = vmatmul.msk.bf16.vlgmr.msrb.gmra.mxu3 %vm956_vm2, %v1354_v27 }
 0x375   : > { %1617 = vmatpush.bf16.msrb.mxu3 %v1608_v2 }
 0x377   : > { %v3100_v32 = vpop.eup %3099 }
 0x378   : > { %v1475_v28 = vmul.f32 %v3100_v32, %v3839_v55 }
 0x379   : > { %v1016_v31 = vpop.f32.mrf.mxu0 }
 0x37a   : > { %1021 = vst.msk [vmem:[#allocation3 + $0x8] sm:$0xff] %vm917_vm0, %v1016_v31  ;;  %v1477_v35 = vpack.c.bf16 %v1475_v28, %v1475_v28 }
 0x37d   : > { %v1592_v34 = vpop.xlane.xlu1 %1591 }
 0x37e   : > { %3101 = vrcp.f32 %v1592_v34 }
 0x380   : > { %v1472_v0 = vpop.xlane.xlu0 %1471 }
 0x381   : > { %v1018_v36 = vpop.f32.mrf.mxu0 }
 0x384   : > { %2730 = vmatmul.msk.bf16.vlgmr.msra.gmra.mxu3 %vm956_vm2, %v1477_v35  ;;  %v3102_v37 = vpop.eup %3101 }
 0x385   : > { %v1349_v11 = vpop.xlane.xlu1 %1348  ;;  %v1598_v45 = vmul.f32 %v3102_v37, %v3850_v33 }
 0x386   : > { %3103 = vrcp.f32 %v1349_v11 }
 0x387   : > { %v1600_v55 = vpack.c.bf16 %v1598_v45, %v1598_v45  ;;  %3105 = vrcp.f32 %v1472_v0 }
 0x388   : > { %v1595_v24 = vpop.xlane.xlu0 %1594 }
 0x38b   : > { %v1715_v51 = vpop.xlane.xlu2 %1714 }
 0x38c   : > { %v3104_v9 = vpop.eup %3103  ;;  %3107 = vrcp.f32 %v1715_v51 }
 0x38d   : > { %v1353_v41 = vmul.f32 %v3104_v9, %v3861_v10  ;;  %v3106_v54 = vpop.eup %3105  ;;  %3109 = vrcp.f32 %v1595_v24 }
 0x38e   : > { %v1476_v56 = vmul.f32 %v3106_v54, %v3856_v39 }
 0x38f   : > { %v1355_v17 = vpack.c.bf16 %v1353_v41, %v1353_v41 }
 0x390   : > { %v1718_v57 = vpop.xlane.xlu0 %1717  ;;  %v1478_v33 = vpack.c.bf16 %v1476_v56, %v1476_v56 }
 0x391   : > { %2727 = vmatmul.msk.bf16.vlgmr.msra.gmra.mxu0 %vm956_vm2, %v1355_v17  ;;  %3111 = vrcp.f32 %v1718_v57 }
 0x392   : > { %1638 = vmatpush.bf16.msra.mxu0 %v1629_v43  ;;  %v3108_v61 = vpop.eup %3107 }
 0x393   : > { %v1721_v53 = vmul.f32 %v3108_v61, %v3867_v50  ;;  %v1849_v63 = vpop.permute.xlu2 %1848  ;;  %v3110_v5 = vpop.eup %3109  ;;  %v2940_v61 = vld [vmem:[%s3520_s3 + $0x30] sm:$0xff] }
 0x394   : > { %2734 = vmatmul.msk.bf16.vlgmr.msrb.gmra.mxu3 %vm956_vm2, %v1600_v55  ;;  %v1854_v4 = vsel %vm984_vm1, %v1849_v63, 0  ;;  %v1599_v44 = vmul.f32 %v3110_v5, %v3865_v46  ;;  %v2937_v63 = vld [vmem:[%s3520_s3 + $0x18] sm:$0xff] }
 0x395   : > { %v1723_v39 = vpack.c.bf16 %v1721_v53, %v1721_v53 }
 0x396   : > { %v1601_v42 = vpack.c.bf16 %v1599_v44, %v1599_v44 }
 0x397   : > { %v3112_v50 = vpop.eup %3111 }
 0x398   : > { %v1722_v8 = vmul.f32 %v3112_v50, %v3873_v52  ;;  %v3047_v50 = vld [vmem:[%s4124_s22] ss:$0 sm:$0xff] }
 0x39a   : > { %v1724_v40 = vpack.c.bf16 %v1722_v8, %v1722_v8 }
 0x39b   : > { %v1870_v6 = vpop.permute.xlu2 %1869 }
 0x39c   : > { %v1875_v58 = vsel %vm984_vm1, %v1870_v6, 0 }
 0x39d   : > { %v1747_v10 = vpop.permute.xlu1 %1746 }
 0x39e   : > { %v1752_v62 = vsel %vm984_vm1, %v1747_v10, 0  ;;  %v2941_v10 = vld [vmem:[%s3520_s3 + $0x38] sm:$0xff] }
 0x39f   : > { %1972 = vmatpush.bf16.msrb.mxu1 %v2941_v10  ;;  %v2949_v10 = vld [vmem:[%s3526_s28 + $0x34] sm:$0xf0] }
 0x3a1   : > { %2731 = vmatmul.msk.bf16.vlgmr.msrb.gmra.mxu0 %vm956_vm2, %v1478_v33  ;;  %v2939_v33 = vld [vmem:[%s3520_s3 + $0x28] sm:$0xff] }
 0x3a2   : > { %1761 = vmatpush.bf16.msrb.mxu0 %v1752_v62  ;;  %v2938_v62 = vld [vmem:[%s3520_s3 + $0x20] sm:$0xff] }
 0x3a3   : > { %v1726_v1 = vpop.permute.xlu0 %1725  ;;  %1973 = vmatpush.bf16.msrb.mxu1 %v2940_v61  ;;  %v2948_v61 = vld [vmem:[%s3526_s28 + $0x34] sm:$0xf] }
 0x3a4   : > { %v1731_v3 = vsel %vm984_vm1, %v1726_v1, 0  ;;  %v2936_v1 = vld [vmem:[%s3520_s3 + $0x10] sm:$0xff] }
 0x3a5   : > { %1740 = vmatpush.bf16.msra.mxu3 %v1731_v3  ;;  %v2935_v3 = vld [vmem:[%s3520_s3 + $0x8] sm:$0xff] }
 0x3a7   : > { %1974 = vmatpush.bf16.msrb.mxu1 %v2939_v33 }
 0x3a8   : > { %2738 = vmatmul.msk.bf16.vlgmr.msra.gmra.mxu3 %vm956_vm2, %v1723_v39 }
 0x3a9   : > { %1863 = vmatpush.bf16.msrb.mxu3 %v1854_v4  ;;  %v2934_v4 = vld [vmem:[%s3520_s3] sm:$0xff] }
 0x3ab   : > { %1975 = vmatpush.bf16.msrb.mxu1 %v2938_v62  ;;  %v2804_v62 = vld [vmem:[%s3526_s28 + $0x38] sm:$0xf0] }
 0x3af   : > { %1976 = vmatpush.bf16.msrb.mxu1 %v2937_v63  ;;  %v2794_v63 = vld [vmem:[%s3526_s28 + $0x20] sm:$0xf] }
 0x3b1   : > { %2735 = vmatmul.msk.bf16.vlgmr.msra.gmra.mxu0 %vm956_vm2, %v1601_v42 }
 0x3b2   : > { %1884 = vmatpush.bf16.msra.mxu0 %v1875_v58 }
 0x3b3   : > { %1977 = vmatpush.bf16.msrb.mxu1 %v2936_v1  ;;  %v2947_v1 = vld [vmem:[%s3526_s28 + $0x24] sm:$0xf0] }
 0x3b7   : > { %1978 = vmatpush.bf16.msrb.mxu1 %v2935_v3  ;;  %v2946_v3 = vld [vmem:[%s3526_s28 + $0x24] sm:$0xf] }
 0x3b9   : > { %v1124_v7 = vpop.f32.mrf.mxu3 }
 0x3ba   : > { %1154 = vrot.lane.b32.xlu1 %v1124_v7, %s3307_s23 }
 0x3bb   : > { %1979 = vmatpush.bf16.msrb.mxu1 %v2934_v4  ;;  %v2795_v4 = vor.u32 %v2947_v1, %v2794_v63  ;;  %v2064_v63 = vld [vmem:[%s3568_s11] sm:$0x3] }
 0x3c1   : > { %v1126_v13 = vpop.f32.mrf.mxu3  ;;  %2739 = vmatmul.msk.bf16.vlgmr.msrb.gmra.mxu0 %vm956_vm2, %v1724_v40  ;;  %v3127_v40 = vld [vmem:[#allocation2] sm:$0xff] }
 0x3c3   : > { %v1148_v49 = vpop.f32.mrf.mxu0 }
 0x3c4   : > { %1156 = vrot.lane.b32.xlu2 %v1148_v49, %s3307_s23 }
 0x3c8   : > { %v1838_v46 = vpop.xlane.xlu1 %1837 }
 0x3c9   : > { %3113 = vrcp.f32 %v1838_v46  ;;  %v1250_v14 = vpop.f32.mrf.mxu3 }
 0x3ca   : > { %1277 = vrot.lane.b32.xlu0 %v1250_v14, %s3305_s16  ;;  %v3128_v14 = vld [vmem:[#allocation2 + $0x8] sm:$0xff] }
 0x3cb   : > { %v1150_v18 = vpop.f32.mrf.mxu0 }
 0x3ce   : > { %v1841_v47 = vpop.xlane.xlu0 %1840 }
 0x3cf   : > { %v3114_v59 = vpop.eup %3113  ;;  %3115 = vrcp.f32 %v1841_v47  ;;  %v3308_v47 = vmov 128.0  }
 0x3d0   : > { %v1844_v15 = vmul.f32 %v3114_v59, %v3900_v60  ;;  %3117 = vrcp.f32 %v3308_v47 }
 0x3d1   : > { %v1252_v26 = vpop.f32.mrf.mxu3 }
 0x3d2   : > { %v1846_v52 = vpack.c.bf16 %v1844_v15, %v1844_v15 }
 0x3d3   : > { %v1271_v29 = vpop.f32.mrf.mxu0 }
 0x3d4   : > { %1279 = vrot.lane.b32.xlu2 %v1271_v29, %s3305_s16  ;;  %2742 = vmatmul.msk.bf16.vlgmr.msrb.gmra.mxu3 %vm956_vm2, %v1846_v52 }
 0x3d5   : > { %v3116_v16 = vpop.eup %3115 }
 0x3d6   : > { %v1845_v19 = vmul.f32 %v3116_v16, %v3908_v30  ;;  %v3118_v59 = vpop.eup %3117 }
 0x3d7   : > { %v1995_v15 = vmul.f32 128.0, %v3118_v59  ;;  %vm1999_vm10 = vweird.f32 %v3118_v59 }
 0x3d8   : > { %v1847_v20 = vpack.c.bf16 %v1845_v19, %v1845_v19 }
 0x3d9   : > { %v1996_v26 = vsub.f32 1.0, %v1995_v15  ;;  %v2965_v15 = vld [vmem:[%s3528_s21 + $0x38] sm:$0xff] }
 0x3da   : > { %2743 = vmatmul.msk.bf16.vlgmr.msra.gmra.mxu0 %vm956_vm2, %v1847_v20 }
 0x3db   : > { %v1273_v21 = vpop.f32.mrf.mxu0  ;;  %v1997_v52 = vmul.f32 %v3118_v59, %v1996_v26  ;;  %v2973_v26 = vld [vmem:[%s3528_s21 + $0x78] sm:$0xff]  ;;  %2316 = vmatpush.bf16.msrb.mxu0 %v2965_v15 }
 0x3dc   : > { %2330 = vmatpush.bf16.msra.mxu1 %v2973_v26 }
 0x3dd   : > { %v1998_v29 = vadd.f32 %v3118_v59, %v1997_v52 }
 0x3df   : > { %v3968_v16 = vsel %vm1999_vm10, %v3118_v59, %v1998_v29 }
 0x3f7   : > { %v1373_v22 = vpop.f32.mrf.mxu3 }
 0x3f8   : > { %1400 = vrot.lane.b32.xlu2 %v1373_v22, %s3306_s27 }
 0x3ff   : > { %v1375_v48 = vpop.f32.mrf.mxu3 }
 0x407   : > { %v1496_v23 = vpop.f32.mrf.mxu3 }
 0x408   : > { %1523 = vrot.lane.b32.xlu2 %v1496_v23, %s3304_s25 }
 0x40e   : > { %v1394_v60 = vpop.f32.mrf.mxu0 }
 0x40f   : > { %1402 = vrot.lane.b32.xlu1 %v1394_v60, %s3306_s27  ;;  %v1498_v25 = vpop.f32.mrf.mxu3 }
 0x416   : > { %v1396_v27 = vpop.f32.mrf.mxu0 }
 0x417   : > { %v1619_v12 = vpop.f32.mrf.mxu3  ;;  %v2834_v27 = vld [vmem:[%s3526_s28 + $0x70] sm:$0xf] }
 0x418   : > { %1646 = vrot.lane.b32.xlu1 %v1619_v12, %s3303_s18  ;;  %v2957_v12 = vld [vmem:[%s3526_s28 + $0x74] sm:$0xf0] }
 0x41e   : > { %v1517_v30 = vpop.f32.mrf.mxu0  ;;  %v1157_v2 = vpop.permute.xlu2 %1156 }
 0x41f   : > { %1162 = vst.msk [vmem:[#allocation3 + $0x8] sm:$0xff] %vm1160_vm3, %v1157_v2  ;;  %1525 = vrot.lane.b32.xlu0 %v1517_v30, %s3304_s25  ;;  %v1621_v38 = vpop.f32.mrf.mxu3  ;;  %v2956_v30 = vld [vmem:[%s3526_s28 + $0x74] sm:$0xf]  ;;  %v2835_v2 = vor.u32 %v2957_v12, %v2834_v27  ;;  %v2971_v27 = vld [vmem:[%s3528_s21 + $0x68] sm:$0xff] }
 0x420   : > { %v2836_v38 = vld [vmem:[%s3526_s28 + $0x78] sm:$0xf0] }
 0x421   : > { %2150 = vmatpush.bf16.msrb.mxu2 %v2835_v2  ;;  %v2962_v2 = vld [vmem:[%s3528_s21 + $0x20] sm:$0xff] }
 0x426   : > { %v1519_v31 = vpop.f32.mrf.mxu0 }
 0x427   : > { %v2839_v31 = vor.u32 %v2956_v30, %v2836_v38  ;;  %v2970_v38 = vld [vmem:[%s3528_s21 + $0x60] sm:$0xff] }
 0x429   : > { %2164 = vmatpush.bf16.msra.mxu3 %v2839_v31 }
 0x42b   : > { %v1742_v32 = vpop.f32.mrf.mxu3 }
 0x42c   : > { %v1155_v34 = vpop.permute.xlu1 %1154  ;;  %1769 = vrot.lane.b32.xlu0 %v1742_v32, %s3301_s9  ;;  %v2826_v32 = vld [vmem:[%s3526_s28 + $0x60] sm:$0xf] }
 0x42d   : > { %1161 = vst.msk [vmem:[#allocation3] sm:$0xff] %vm1160_vm3, %v1155_v34  ;;  %v2955_v34 = vld [vmem:[%s3526_s28 + $0x64] sm:$0xf0] }
 0x42e   : > { %v1640_v28 = vpop.f32.mrf.mxu0  ;;  %v1280_v35 = vpop.permute.xlu2 %1279 }
 0x42f   : > { %1285 = vst.msk [vmem:[#allocation3 + $0x8] sm:$0xff] %vm1283_vm4, %v1280_v35  ;;  %1648 = vrot.lane.b32.xlu2 %v1640_v28, %s3303_s18  ;;  %v2954_v28 = vld [vmem:[%s3526_s28 + $0x64] sm:$0xf]  ;;  %v2827_v35 = vor.u32 %v2955_v34, %v2826_v32 }
 0x431   : > { %2151 = vmatpush.bf16.msrb.mxu2 %v2827_v35 }
 0x433   : > { %v1744_v36 = vpop.f32.mrf.mxu3 }
 0x434   : > { %v2828_v36 = vld [vmem:[%s3526_s28 + $0x68] sm:$0xf0] }
 0x436   : > { %v1642_v11 = vpop.f32.mrf.mxu0 }
 0x437   : > { %v2831_v11 = vor.u32 %v2954_v28, %v2828_v36 }
 0x439   : > { %2165 = vmatpush.bf16.msra.mxu3 %v2831_v11 }
 0x43c   : > { %v1278_v0 = vpop.permute.xlu0 %1277 }
 0x43d   : > { %1284 = vst.msk [vmem:[#allocation3] sm:$0xff] %vm1283_vm4, %v1278_v0  ;;  %v2818_v0 = vld [vmem:[%s3526_s28 + $0x50] sm:$0xf] }
 0x43e   : > { %v1763_v37 = vpop.f32.mrf.mxu0 }
 0x43f   : > { %1771 = vrot.lane.b32.xlu1 %v1763_v37, %s3301_s9  ;;  %v2953_v37 = vld [vmem:[%s3526_s28 + $0x54] sm:$0xf0] }
 0x446   : > { %v1765_v9 = vpop.f32.mrf.mxu0 }
 0x447   : > { %v2952_v9 = vld [vmem:[%s3526_s28 + $0x54] sm:$0xf] }
 0x452   : > { %v1401_v41 = vpop.permute.xlu2 %1400 }
 0x453   : > { %1407 = vst.msk [vmem:[#allocation3] sm:$0xff] %vm1406_vm5, %v1401_v41  ;;  %v2819_v41 = vor.u32 %v2953_v37, %v2818_v0 }
 0x455   : > { %2152 = vmatpush.bf16.msrb.mxu2 %v2819_v41 }
 0x457   : > { %v1865_v45 = vpop.f32.mrf.mxu3  ;;  %v1886_v17 = vpop.f32.mrf.mxu0 }
 0x458   : > { %1894 = vrot.lane.b32.xlu0 %v1886_v17, %s3302_s15  ;;  %1892 = vrot.lane.b32.xlu2 %v1865_v45, %s3302_s15  ;;  %v2820_v45 = vld [vmem:[%s3526_s28 + $0x58] sm:$0xf0] }
 0x459   : > { %v2823_v17 = vor.u32 %v2952_v9, %v2820_v45  ;;  %v3048_v9 = vld [vmem:[%s4125_s8] ss:$0 sm:$0xff] }
 0x45b   : > { %2166 = vmatpush.bf16.msra.mxu3 %v2823_v17 }
 0x45f   : > { %v1867_v43 = vpop.f32.mrf.mxu3  ;;  %v1888_v24 = vpop.f32.mrf.mxu0 }
 0x460   : > { %v2810_v43 = vld [vmem:[%s3526_s28 + $0x40] sm:$0xf]  ;;  %v2951_v24 = vld [vmem:[%s3526_s28 + $0x44] sm:$0xf0] }
 0x462   : > { %v1524_v55 = vpop.permute.xlu2 %1523 }
 0x463   : > { %1530 = vst.msk [vmem:[#allocation3] sm:$0xff] %vm1529_vm6, %v1524_v55  ;;  %v2950_v55 = vld [vmem:[%s3526_s28 + $0x44] sm:$0xf] }
 0x481   : > { %v1403_v51 = vpop.permute.xlu1 %1402 }
 0x482   : > { %1408 = vst.msk [vmem:[#allocation3 + $0x8] sm:$0xff] %vm1406_vm5, %v1403_v51  ;;  %v2811_v51 = vor.u32 %v2951_v24, %v2810_v43 }
 0x484   : > { %2153 = vmatpush.bf16.msrb.mxu2 %v2811_v51 }
 0x489   : > { %v1649_v57 = vpop.permute.xlu2 %1648 }
 0x48a   : > { %v1647_v54 = vpop.permute.xlu1 %1646 }
 0x48b   : > { %1653 = vst.msk [vmem:[#allocation3] sm:$0xff] %vm1652_vm7, %v1647_v54  ;;  %v2812_v54 = vld [vmem:[%s3526_s28 + $0x48] sm:$0xf0] }
 0x491   : > { %v1526_v56 = vpop.permute.xlu0 %1525 }
 0x492   : > { %1531 = vst.msk [vmem:[#allocation3 + $0x8] sm:$0xff] %vm1529_vm6, %v1526_v56  ;;  %v2815_v56 = vor.u32 %v2950_v55, %v2812_v54 }
 0x493   : > { %1654 = vst.msk [vmem:[#allocation3 + $0x8] sm:$0xff] %vm1652_vm7, %v1649_v57  ;;  %v2802_v57 = vld [vmem:[%s3526_s28 + $0x30] sm:$0xf] }
 0x494   : > { %2167 = vmatpush.bf16.msra.mxu3 %v2815_v56  ;;  %v2803_v33 = vor.u32 %v2949_v10, %v2802_v57  ;;  %v2961_v56 = vld [vmem:[%s3528_s21 + $0x18] sm:$0xff]  ;;  %v2968_v10 = vld [vmem:[%s3528_s21 + $0x50] sm:$0xff] }
 0x495   : > { %v2969_v57 = vld [vmem:[%s3528_s21 + $0x58] sm:$0xff] }
 0x496   : > { %2154 = vmatpush.bf16.msrb.mxu2 %v2803_v33  ;;  %v2967_v33 = vld [vmem:[%s3528_s21 + $0x48] sm:$0xff] }
 0x49a   : > { %2155 = vmatpush.bf16.msrb.mxu2 %v2795_v4  ;;  %v2066_v4 = vperm.slane %v2064_v63, 0 }
 0x49e   : > { %v1770_v53 = vpop.permute.xlu0 %1769 }
 0x49f   : > { %1776 = vst.msk [vmem:[#allocation3] sm:$0xff] %vm1775_vm8, %v1770_v53  ;;  %v2807_v53 = vor.u32 %v2948_v61, %v2804_v62  ;;  %v2959_v61 = vld [vmem:[%s3528_s21 + $0x8] sm:$0xff]  ;;  %v2958_v62 = vld [vmem:[%s3528_s21] sm:$0xff] }
 0x4a1   : > { %2168 = vmatpush.bf16.msra.mxu3 %v2807_v53  ;;  %v2966_v53 = vld [vmem:[%s3528_s21 + $0x40] sm:$0xff] }
 0x4b1   : > { %v1772_v39 = vpop.permute.xlu1 %1771 }
 0x4b2   : > { %1777 = vst.msk [vmem:[#allocation3 + $0x8] sm:$0xff] %vm1775_vm8, %v1772_v39  ;;  %v1893_v5 = vpop.permute.xlu2 %1892  ;;  %v2796_v39 = vld [vmem:[%s3526_s28 + $0x28] sm:$0xf0] }
 0x4b3   : > { %1899 = vst.msk [vmem:[#allocation3] sm:$0xff] %vm1898_vm9, %v1893_v5  ;;  %v2799_v5 = vor.u32 %v2946_v3, %v2796_v39  ;;  %v2067_v39 = vperm.slane %v2064_v63, 1 }
 0x4b5   : > { %2169 = vmatpush.bf16.msra.mxu3 %v2799_v5 }
 0x4ba   : > { %v1901_v6 = vld [vmem:[#allocation3] sm:$0xff] }
 0x4ca   : > { %v1895_v44 = vpop.permute.xlu0 %1894 }
 0x4cb   : > { %1900 = vst.msk [vmem:[#allocation3 + $0x8] sm:$0xff] %vm1898_vm9, %v1895_v44  ;;  %v2786_v44 = vld [vmem:[%s3526_s28 + $0x10] sm:$0xf] }
 0x4d2   : > { %v1902_v42 = vld [vmem:[#allocation3 + $0x8] sm:$0xff] }
 0x4d3   : > { %v1903_v58 = vpack.c.bf16 %v1902_v42, %v1901_v6  ;;  %v2945_v6 = vld [vmem:[%s3526_s28 + $0x14] sm:$0xf0]  ;;  %v2944_v42 = vld [vmem:[%s3526_s28 + $0x14] sm:$0xf] }
 0x4d5   : > { %1980 = vmatmul.bf16.vlgmr.msrb.gmra.mxu1 %v1903_v58 }
 0x552   : > { %v1981_v7 = vpop.f32.mrf.mxu1 }
 0x553   : > { %v1982_v8 = vadd.f32 %v3047_v50, %v1981_v7  ;;  %v2788_v7 = vld [vmem:[%s3526_s28 + $0x18] sm:$0xf0] }
 0x555   : > { %v1986_v13 = vadd.f32 %v3127_v40, %v1982_v8  ;;  %v2778_v8 = vld [vmem:[%s3526_s28] sm:$0xf]  ;;  %v2943_v40 = vld [vmem:[%s3526_s28 + $0x4] sm:$0xf0] }
 0x557   : > { %1990 = vadd.xlane.f32.xlu1 %v1986_v13 }
 0x55a   : > { %v1983_v49 = vpop.f32.mrf.mxu1 }
 0x55b   : > { %v1984_v46 = vadd.f32 %v3047_v50, %v1983_v49  ;;  %v2787_v50 = vor.u32 %v2945_v6, %v2786_v44  ;;  %v2791_v49 = vor.u32 %v2944_v42, %v2788_v7 }
 0x55d   : > { %v1987_v18 = vadd.f32 %v3128_v14, %v1984_v46  ;;  %v2942_v46 = vld [vmem:[%s3526_s28 + $0x4] sm:$0xf]  ;;  %v2780_v14 = vld [vmem:[%s3526_s28 + $0x8] sm:$0xf0]  ;;  %2156 = vmatpush.bf16.msrb.mxu2 %v2787_v50  ;;  %2170 = vmatpush.bf16.msra.mxu3 %v2791_v49 }
 0x55e   : > { %v2783_v59 = vor.u32 %v2942_v46, %v2780_v14  ;;  %v3050_v14 = vld [vmem:[%s688_s20] ss:$0 sm:$0xff] }
 0x55f   : > { %1992 = vadd.xlane.f32.xlu2 %v1987_v18 }
 0x561   : > { %2171 = vmatpush.bf16.msra.mxu3 %v2783_v59 }
 0x5ca   : > { %v1991_v19 = vpop.xlane.xlu1 %1990 }
 0x5cb   : > { %v2001_v20 = vmul.f32 %v3968_v16, %v1991_v19  ;;  %v2964_v19 = vld [vmem:[%s3528_s21 + $0x30] sm:$0xff] }
 0x5cc   : > { %2317 = vmatpush.bf16.msrb.mxu0 %v2964_v19 }
 0x5cd   : > { %v3971_v21 = vsub.f32 %v1986_v13, %v2001_v20  ;;  %v2972_v20 = vld [vmem:[%s3528_s21 + $0x70] sm:$0xff] }
 0x5ce   : > { %2331 = vmatpush.bf16.msra.mxu1 %v2972_v20 }
 0x5cf   : > { %v2005_v22 = vmul.f32 %v3971_v21, %v3971_v21 }
 0x5d1   : > { %2007 = vadd.xlane.f32.xlu0 %v2005_v22 }
 0x5d2   : > { %v1993_v48 = vpop.xlane.xlu2 %1992  ;;  %2332 = vmatpush.bf16.msra.mxu1 %v2971_v27 }
 0x5d3   : > { %v2002_v23 = vmul.f32 %v3968_v16, %v1993_v48 }
 0x5d5   : > { %v3976_v60 = vsub.f32 %v1987_v18, %v2002_v23  ;;  %v2779_v18 = vor.u32 %v2943_v40, %v2778_v8 }
 0x5d6   : > { %2333 = vmatpush.bf16.msra.mxu1 %v2970_v38 }
 0x5d7   : > { %v2006_v25 = vmul.f32 %v3976_v60, %v3976_v60  ;;  %2157 = vmatpush.bf16.msrb.mxu2 %v2779_v18 }
 0x5d9   : > { %2009 = vadd.xlane.f32.xlu2 %v2006_v25  ;;  %v2963_v25 = vld [vmem:[%s3528_s21 + $0x28] sm:$0xff] }
 0x5da   : > { %2318 = vmatpush.bf16.msrb.mxu0 %v2963_v25  ;;  %2334 = vmatpush.bf16.msra.mxu1 %v2969_v57 }
 0x5de   : > { %2319 = vmatpush.bf16.msrb.mxu0 %v2962_v2  ;;  %2335 = vmatpush.bf16.msra.mxu1 %v2968_v10 }
 0x5e2   : > { %2320 = vmatpush.bf16.msrb.mxu0 %v2961_v56  ;;  %2336 = vmatpush.bf16.msra.mxu1 %v2967_v33 }
 0x5e6   : > { %2337 = vmatpush.bf16.msra.mxu1 %v2966_v53 }
 0x644   : > { %v2008_v58 = vpop.xlane.xlu0 %2007 }
 0x645   : > { %v2011_v13 = vmul.f32 %v2008_v58, %v3968_v16 }
 0x647   : > { %v2013_v47 = vadd.f32 1e-05, %v2011_v13 }
 0x649   : > { %3119 = vrsqrt.f32 %v2013_v47  ;;  %vm2021_vm12 = vweird.f32 %v2013_v47 }
 0x64c   : > { %v2010_v52 = vpop.xlane.xlu2 %2009 }
 0x64d   : > { %v2012_v29 = vmul.f32 %v2010_v52, %v3968_v16 }
 0x64f   : > { %v3120_v22 = vpop.eup %3119  ;;  %v2014_v48 = vadd.f32 1e-05, %v2012_v29 }
 0x650   : > { %v2016_v23 = vmul.f32 %v3120_v22, %v2013_v47  ;;  %vm2022_vm11 = vweird.f32 %v3120_v22 }
 0x651   : > { %3121 = vrsqrt.f32 %v2014_v48  ;;  %vm2023_vm13 = vmor %vm2021_vm12, %vm2022_vm11  ;;  %vm2031_vm15 = vweird.f32 %v2014_v48 }
 0x652   : > { %v2017_v12 = vmul.f32 %v3120_v22, %v2016_v23 }
 0x654   : > { %v2018_v30 = vmul.f32 0.5, %v2017_v12 }
 0x656   : > { %v2019_v31 = vsub.f32 1.5, %v2018_v30 }
 0x657   : > { %v3122_v32 = vpop.eup %3121 }
 0x658   : > { %v2020_v34 = vmul.f32 %v3120_v22, %v2019_v31  ;;  %v2026_v28 = vmul.f32 %v3122_v32, %v2014_v48  ;;  %vm2032_vm14 = vweird.f32 %v3122_v32 }
 0x659   : > { %vm2033_vm0 = vmor %vm2031_vm15, %vm2032_vm14 }
 0x65a   : > { %v2027_v35 = vmul.f32 %v3122_v32, %v2026_v28  ;;  %v2024_v36 = vsel %vm2023_vm13, %v3120_v22, %v2020_v34 }
 0x65b   : > { %v2035_v37 = vmul.f32 %v2024_v36, %v3971_v21  ;;  %v3049_v21 = vld [vmem:[%s4126_s30] ss:$0 sm:$0xff] }
 0x65c   : > { %v2028_v11 = vmul.f32 0.5, %v2027_v35 }
 0x65d   : > { %v2040_v43 = vmul.f32 %v3048_v9, %v2035_v37 }
 0x65e   : > { %v2029_v0 = vsub.f32 1.5, %v2028_v11 }
 0x65f   : > { %v2045_v55 = vadd.f32 %v3049_v21, %v2040_v43 }
 0x660   : > { %v2030_v41 = vmul.f32 %v3122_v32, %v2029_v0 }
 0x662   : > { %v2034_v45 = vsel %vm2033_vm0, %v3122_v32, %v2030_v41 }
 0x663   : > { %v2036_v17 = vmul.f32 %v2034_v45, %v3976_v60  ;;  %v2960_v60 = vld [vmem:[%s3528_s21 + $0x10] sm:$0xff] }
 0x664   : > { %2321 = vmatpush.bf16.msrb.mxu0 %v2960_v60 }
 0x665   : > { %v2041_v24 = vmul.f32 %v3048_v9, %v2036_v17 }
 0x667   : > { %v2046_v51 = vadd.f32 %v3049_v21, %v2041_v24  ;;  %v3051_v21 = vld [vmem:[%s678_s24] ss:$0 sm:$0xff]  ;;  %s4129_s24 = sld [smem:[#allocation25_spill]] (!%p2904_p10) }
 0x668   : > { %2322 = vmatpush.bf16.msrb.mxu0 %v2959_v61 }
 0x669   : > { %v2047_v54 = vpack.c.bf16 %v2046_v51, %v2045_v55 }
 0x66b   : > { %2158 = vmatmul.bf16.vlgmr.msrb.gmra.mxu2 %v2047_v54  ;;  %2172 = vmatmul.bf16.vlgmr.msra.gmra.mxu3 %v2047_v54 }
 0x66c   : > { %2323 = vmatpush.bf16.msrb.mxu0 %v2958_v62 }
 0x6ee   : > { %v2159_v1 = vpop.f32.mrf.mxu2  ;;  %v2173_v3 = vpop.f32.mrf.mxu3 }
 0x6ef   : > { %v2160_v5 = vadd.f32 %v2159_v1, %v2066_v4  ;;  %v2174_v44 = vadd.f32 %v2173_v3, %v2067_v39 }
 0x6f1   : > { %v2178_v7 = vmax.f32 %v2160_v5, 0.0  ;;  %v2179_v8 = vmax.f32 %v2174_v44, 0.0 }
 0x6f6   : > { %v2161_v6 = vpop.f32.mrf.mxu2  ;;  %v2175_v42 = vpop.f32.mrf.mxu3 }
 0x6f7   : > { %v2162_v58 = vadd.f32 %v2161_v6, %v2066_v4  ;;  %v2176_v50 = vadd.f32 %v2175_v42, %v2067_v39 }
 0x6f9   : > { %v2180_v40 = vmax.f32 %v2162_v58, 0.0  ;;  %v2181_v13 = vmax.f32 %v2176_v50, 0.0 }
 0x6fb   : > { %v2182_v49 = vpack.c.bf16 %v2180_v40, %v2178_v7  ;;  %v2183_v46 = vpack.c.bf16 %v2181_v13, %v2179_v8 }
 0x6fd   : > { %2324 = vmatmul.bf16.vlgmr.msrb.gmra.mxu0 %v2182_v49  ;;  %2338 = vmatmul.bf16.vlgmr.msra.gmra.mxu1 %v2183_v46 }
 0x77a   : > { %v2325_v18 = vpop.f32.mrf.mxu0  ;;  %v2339_v47 = vpop.f32.mrf.mxu1 }
 0x77b   : > { %v2326_v59 = vadd.f32 %v3050_v14, %v2325_v18 }
 0x77d   : > { %v2340_v15 = vadd.f32 %v2339_v47, %v2326_v59 }
 0x77f   : > { %v2344_v26 = vadd.f32 %v2340_v15, %v2045_v55  ;;  %v3052_v55 = vld [vmem:[%s681_s10] ss:$0 sm:$0xff] }
 0x781   : > { %2348 = vadd.xlane.f32.xlu1 %v2344_v26 }
 0x782   : > { %v2327_v52 = vpop.f32.mrf.mxu0  ;;  %v2341_v19 = vpop.f32.mrf.mxu1 }
 0x783   : > { %v2328_v29 = vadd.f32 %v3050_v14, %v2327_v52 }
 0x785   : > { %v2342_v20 = vadd.f32 %v2341_v19, %v2328_v29 }
 0x787   : > { %v2345_v22 = vadd.f32 %v2342_v20, %v2046_v51 }
 0x789   : > { %2350 = vadd.xlane.f32.xlu0 %v2345_v22 }
 0x7f4   : > { %v2349_v48 = vpop.xlane.xlu1 %2348 }
 0x7f5   : > { %v2352_v23 = vmul.f32 %v2349_v48, %v3968_v16 }
 0x7f7   : > { %v2354_v25 = vsub.f32 %v2344_v26, %v2352_v23 }
 0x7f9   : > { %v2356_v27 = vmul.f32 %v2354_v25, %v2354_v25 }
 0x7fb   : > { %2358 = vadd.xlane.f32.xlu2 %v2356_v27 }
 0x7fc   : > { %v2351_v12 = vpop.xlane.xlu0 %2350 }
 0x7fd   : > { %v2353_v30 = vmul.f32 %v2351_v12, %v3968_v16 }
 0x7ff   : > { %v2355_v2 = vsub.f32 %v2345_v22, %v2353_v30 }
 0x801   : > { %v2357_v38 = vmul.f32 %v2355_v2, %v2355_v2 }
 0x803   : > { %2360 = vadd.xlane.f32.xlu1 %v2357_v38 }
 0x86e   : > { %v2359_v31 = vpop.xlane.xlu2 %2358 }
 0x86f   : > { %v2362_v32 = vmul.f32 %v2359_v31, %v3968_v16 }
 0x871   : > { %v2364_v34 = vadd.f32 1e-05, %v2362_v32 }
 0x873   : > { %3123 = vrsqrt.f32 %v2364_v34  ;;  %vm2372_vm2 = vweird.f32 %v2364_v34 }
 0x876   : > { %v2361_v28 = vpop.xlane.xlu1 %2360 }
 0x877   : > { %v2363_v35 = vmul.f32 %v2361_v28, %v3968_v16 }
 0x879   : > { %v3124_v36 = vpop.eup %3123  ;;  %v2365_v11 = vadd.f32 1e-05, %v2363_v35 }
 0x87a   : > { %v2367_v0 = vmul.f32 %v3124_v36, %v2364_v34  ;;  %vm2373_vm1 = vweird.f32 %v3124_v36 }
 0x87b   : > { %3125 = vrsqrt.f32 %v2365_v11  ;;  %vm2374_vm3 = vmor %vm2372_vm2, %vm2373_vm1  ;;  %vm2382_vm5 = vweird.f32 %v2365_v11 }
 0x87c   : > { %v2368_v37 = vmul.f32 %v3124_v36, %v2367_v0 }
 0x87e   : > { %v2369_v9 = vmul.f32 0.5, %v2368_v37 }
 0x880   : > { %v2370_v41 = vsub.f32 1.5, %v2369_v9 }
 0x881   : > { %v3126_v45 = vpop.eup %3125 }
 0x882   : > { %v2371_v17 = vmul.f32 %v3124_v36, %v2370_v41  ;;  %v2377_v43 = vmul.f32 %v3126_v45, %v2365_v11  ;;  %vm2383_vm4 = vweird.f32 %v3126_v45 }
 0x883   : > { %vm2384_vm6 = vmor %vm2382_vm5, %vm2383_vm4 }
 0x884   : > { %v2375_v16 = vsel %vm2374_vm3, %v3124_v36, %v2371_v17  ;;  %v2378_v24 = vmul.f32 %v3126_v45, %v2377_v43 }
 0x885   : > { %v2386_v51 = vmul.f32 %v2375_v16, %v2354_v25 }
 0x886   : > { %v2379_v54 = vmul.f32 0.5, %v2378_v24 }
 0x887   : > { %v2391_v56 = vmul.f32 %v3051_v21, %v2386_v51 }
 0x888   : > { %v2380_v57 = vsub.f32 1.5, %v2379_v54 }
 0x889   : > { %v2396_v60 = vadd.f32 %v3052_v55, %v2391_v56 }
 0x88a   : > { %v2381_v10 = vmul.f32 %v3126_v45, %v2380_v57 }
 0x88b   : > { %2398 = vst [vmem:[#allocation2] sm:$0xff] %v2396_v60 }
 0x88c   : > { %v2385_v61 = vsel %vm2384_vm6, %v3126_v45, %v2381_v10 }
 0x88d   : > { %v2387_v33 = vmul.f32 %v2385_v61, %v2355_v2 }
 0x88f   : > { %v2392_v62 = vmul.f32 %v3051_v21, %v2387_v33  ;;  %2403 = sbr.rel (%p2904_p10) target bundleno = 2216 (0x8a8), region = 96 }
 0x891   : > { %v2397_v53 = vadd.f32 %v3052_v55, %v2392_v62 }
 0x893   : > { %2399 = vst [vmem:[#allocation2 + $0x8] sm:$0xff] %v2397_v53 }
 0x894   : > { %v3309_v63 = vmov 2.0   ;;  %v2404_v5 = vadd.f32 %v2397_v53, %v2396_v60 }
 0x895   : > { %3129 = vrcp.f32 %v3309_v63 }
 0x89b   : > { %v3130_v1 = vpop.eup %3129 }
 0x89c   : > { %v2406_v3 = vmul.f32 2.0, %v3130_v1  ;;  %vm2410_vm7 = vweird.f32 %v3130_v1 }
 0x89e   : > { %v2407_v4 = vsub.f32 1.0, %v2406_v3 }
 0x8a0   : > { %v2408_v39 = vmul.f32 %v3130_v1, %v2407_v4 }
 0x8a2   : > { %v2409_v44 = vadd.f32 %v3130_v1, %v2408_v39 }
 0x8a4   : > { %v2411_v6 = vsel %vm2410_vm7, %v3130_v1, %v2409_v44 }
 0x8a5   : > { %v2412_v42 = vmul.f32 %v2411_v6, %v2404_v5 }
 0x8a7   : > { %2413 = vst [vmem:[%s4129_s24] sm:$0xff] %v2412_v42 }
 0x8a8 PF: > { %s4130_s28 = sld [smem:[#allocation15_spill]]  ;;  %s4133_s25 = smov %s3285_s26 }
 0x8a9   : > { %s4131_s29 = sld [smem:[#allocation14_spill]] }
 0x8aa   : > { %s4132_s27 = sld [smem:[#allocation16_spill]] }
 0x8ae   : > { %p29_p5 = scmp.ge.s32.totalorder %s4130_s28, 4  }
 0x8af   : > { %s4134_s26 = smov %s4131_s29 }
 0x8b0   :  { %31 = sbr.rel (!%p29_p5) target bundleno = 17 (0x11), region = 177 }
 0x8b5   :  { %2425 = vsyncpa [#allocation5], 1 }
 0x8b6   :  { %2427 = vsyncpa [#allocation5 + $0x1], 1 }
 0x8b7   :  { %2428 = vsyncpa [#allocation7], 1 }
 0x8b8   :  { %2430 = vsyncpa [#allocation7 + $0x1], 1 }
 0x8b9   :  { %2431 = vsyncpa [#allocation10], 1 }
 0x8ba   :  { %2433 = vsyncpa [#allocation10 + $0x1], 1 }

</bundles_post_ra>
